<compile_context>
chip_gen: v7x
topology: tpu7x:2x2x1
jax: 0.10.0
libtpu: 0.0.40
codegen_flags: <defaults>
</compile_context>

<pallas_src>
import functools
import math

import jax
import jax.numpy as jnp
from jax.experimental import pallas as pl
from jax.experimental.pallas import tpu as pltpu


# --------------------------------------------------------------------------- kernel

def _mlp_kernel(x_ref, wgu_ref, wd_ref, o_ref, acc_ref):
    """One (tm, H) token tile x one ti-slice of the intermediate dim.

    x_ref   : (tm, H)      bf16   resident across the I (reduction) axis
    wgu_ref : (H, 2*ti)    bf16   fused [gate_tile | up_tile] weights, streamed
    wd_ref  : (ti, H)      bf16   down-projection weight tile, streamed
    o_ref   : (tm, H)      output (written on the last I step)
    acc_ref : (tm, H)      f32 accumulator scratch
    """
    j = pl.program_id(1)
    ti = wd_ref.shape[0]

    # Fused gate/up projection: one wide bf16 MXU matmul, f32 accumulation.
    gu = jnp.dot(x_ref[...], wgu_ref[...], preferred_element_type=jnp.float32)
    gate = gu[:, :ti]
    up = gu[:, ti:]

    # SiLU + clamps in f32 (VPU/EUP work rides free next to the MXU).
    gate = gate * jax.nn.sigmoid(gate)
    gate = jnp.clip(gate, -10.0, 10.0)
    up = jnp.clip(up, -10.0, 10.0)
    hidden = jnp.clip(gate * up, -10.0, 10.0)

    # Partial down-projection over this I tile, accumulated in f32.
    partial = jnp.dot(hidden.astype(wd_ref.dtype), wd_ref[...],
                      preferred_element_type=jnp.float32)

    @pl.when(j == 0)
    def _():
        acc_ref[...] = partial          # direct write: no zero store + read-modify-write

    @pl.when(j > 0)
    def _():
        acc_ref[...] += partial

    @pl.when(j == pl.num_programs(1) - 1)
    def _():
        o_ref[...] = acc_ref[...].astype(o_ref.dtype)


# ----------------------------------------------------------------- planning helpers

def _chip_config():
    """Per-generation tm target, core count, and usable VMEM (capacity minus headroom)."""
    kind = ""
    try:
        kind = jax.devices()[0].device_kind.lower()
    except Exception:
        pass
    try:
        vmem_cap = int(pltpu.get_tpu_info().vmem_capacity_bytes)
    except Exception:
        vmem_cap = 64 << 20  # conservative (v7x-sized) fallback
    if "v7" in kind:
        # 64 MiB physical per TC: leave ~8 MiB for Mosaic internal scratch.
        return {"tm_target": 384, "num_cores": 2,
                "vmem_usable": max(min(vmem_cap, 64 << 20) - (8 << 20), 32 << 20)}
    if "v6" in kind:
        return {"tm_target": 640, "num_cores": 1,
                "vmem_usable": max(vmem_cap - (16 << 20), 32 << 20)}
    if "v5" in kind:
        return {"tm_target": 256, "num_cores": 1,
                "vmem_usable": max(vmem_cap - (16 << 20), 32 << 20)}
    return {"tm_target": 512, "num_cores": 1,
            "vmem_usable": max(vmem_cap - (16 << 20), 32 << 20)}


def _pick_tile(dim, target, multiples):
    """Largest tile <= target that divides `dim` and is a multiple of one of `multiples`
    (tried in order); falls back to the full dim (full-extent block is always legal)."""
    if dim <= target:
        return dim
    for mult in multiples:
        t = (target // mult) * mult
        while t >= mult:
            if dim % t == 0:
                return t
            t -= mult
    return dim


def _vmem_needed(tm, ti, H, out_isz, w_isz=2):
    streamed_w = 2 * (H * 2 * ti + ti * H) * w_isz    # double-buffered weight tiles
    x_tiles = 2 * tm * H * w_isz                      # resident x tile (+pipeline buffer)
    out_tiles = 2 * tm * H * out_isz
    acc = tm * H * 4                                  # f32 accumulator scratch
    # Compiler temporaries in the body: f32 gu, f32 gate/up/hidden, bf16 hidden.
    temps = tm * 2 * ti * 4 + 3 * tm * ti * 4 + tm * ti * w_isz
    return streamed_w + x_tiles + out_tiles + acc + temps


def _select_tiles(M, I, H, out_isz, cfg):
    # tm drives arithmetic intensity (~tm FLOPs per streamed weight byte):
    # take the largest per-chip target that divides M, aligned to MXU rows / sublanes.
    tm = _pick_tile(M, cfg["tm_target"], (256, 128, 16, 8))
    # Keep the parallel M axis shardable across TensorCores (v7x: 2 TCs/chip).
    nc = cfg["num_cores"]
    if nc > 1 and (M // tm) % nc != 0:
        for cand in range(min(tm, M), 0, -1):
            if M % cand == 0 and cand % 8 == 0 and (M // cand) % nc == 0:
                tm = cand
                break
    # ti only affects buffer size, not intensity: shrink it first to fit VMEM.
    ti = _pick_tile(I, 512, (256, 128))
    budget = cfg["vmem_usable"] - (4 << 20)
    while (ti > 128 and ti % 2 == 0 and I % (ti // 2) == 0
           and _vmem_needed(tm, ti, H, out_isz) > budget):
        ti //= 2
    while (tm > 16 and tm % 2 == 0 and M % (tm // 2) == 0
           and _vmem_needed(tm, ti, H, out_isz) > budget):
        tm //= 2
    return tm, ti


def prepare_llama_mlp(w_gate, w_up, w_down, *, M_hint, tm=None, ti=None,
                      compute_dtype=jnp.bfloat16, out_dtype=jnp.float32):
    """One-time weight fusion + tile / VMEM planning. Call at init, NOT per forward.

    w_gate/w_up: (H, I), w_down: (I, H) — (in, out) layout so x @ W == x @ W_linear.T.
    """
    H, I = w_gate.shape
    cfg = _chip_config()
    out_isz = jnp.dtype(out_dtype).itemsize
    auto_tm, auto_ti = _select_tiles(M_hint, I, H, out_isz, cfg)
    tm = auto_tm if tm is None else tm
    ti = auto_ti if ti is None else ti
    assert M_hint % tm == 0 and I % ti == 0

    n_i = I // ti
    # Tile-wise [gate | up] fusion: each I tile becomes one (H, 2*ti) slab -> a single
    # wide, lane-dense MXU matmul per grid step. Done ONCE here, not per call.
    w_gu = jnp.concatenate(
        [w_gate.reshape(H, n_i, ti), w_up.reshape(H, n_i, ti)], axis=2
    ).reshape(H, 2 * I).astype(compute_dtype)
    w_d = w_down.astype(compute_dtype)

    vmem_limit = int(min(max(_vmem_needed(tm, ti, H, out_isz) + (4 << 20), 32 << 20),
                         cfg["vmem_usable"]))
    return {"w_gu": w_gu, "w_d": w_d, "tm": tm, "ti": ti, "vmem_limit": vmem_limit}


# ---------------------------------------------------------------------------- forward

@functools.partial(jax.jit, static_argnames=("tm", "ti", "vmem_limit_bytes"))
def llama_mlp_pallas(x, w_gu, w_d, *, tm, ti, vmem_limit_bytes):
    """x: (B, S, H); w_gu: (H, 2*I) pre-fused bf16; w_d: (I, H) bf16."""
    B, S, H = x.shape
    I = w_d.shape[0]
    M = B * S
    assert M % tm == 0 and I % ti == 0
    n_m, n_i = M // tm, I // ti

    compute_dtype = w_d.dtype
    out_dtype = x.dtype
    out_isz = jnp.dtype(out_dtype).itemsize
    w_isz = jnp.dtype(compute_dtype).itemsize

    x2 = x.reshape(M, H).astype(compute_dtype)

    cost = pl.CostEstimate(
        flops=6 * M * H * I,                         # gate + up + down matmuls
        transcendentals=M * I,                       # sigmoid
        # Streamed weights are re-read once per M tile (n_m times).
        bytes_accessed=(x2.size * w_isz
                        + n_m * (w_gu.size + w_d.size) * w_isz
                        + M * H * out_isz),
    )

    out = pl.pallas_call(
        _mlp_kernel,
        out_shape=jax.ShapeDtypeStruct((M, H), out_dtype),
        grid_spec=pltpu.PrefetchScalarGridSpec(
            num_scalar_prefetch=0,
            grid=(n_m, n_i),
            in_specs=[
                # x tile: resident across the I (reduction) axis.
                pl.BlockSpec((tm, H), lambda i, j: (i, 0)),
                # Fused gate/up weight slab: streamed along I.
                pl.BlockSpec((H, 2 * ti), lambda i, j: (0, j)),
                # Down-proj weight tile: streamed along I.
                pl.BlockSpec((ti, H), lambda i, j: (j, 0)),
            ],
            out_specs=pl.BlockSpec((tm, H), lambda i, j: (i, 0)),
            scratch_shapes=[pltpu.VMEM((tm, H), jnp.float32)],
        ),
        compiler_params=pltpu.CompilerParams(
            dimension_semantics=("parallel", "arbitrary"),
            vmem_limit_bytes=vmem_limit_bytes,
        ),
        cost_estimate=cost,
    )(x2, w_gu, w_d)
    return out.reshape(B, S, H)


# ------------------------------------------------------------------------ references

def _xavier_uniform(key, fan_in, fan_out):
    # Matches nn.init.xavier_uniform_ (gain=1.0) on a (out, in) weight, then
    # transposed to (in, out) layout for the kernel.
    bound = math.sqrt(6.0 / (fan_in + fan_out))
    w = jax.random.uniform(key, (fan_out, fan_in), jnp.float32, -bound, bound)
    return w.T  # (in, out)


def _reference(x, w_gate, w_up, w_down, compute_dtype=jnp.float32):
    cd = compute_dtype
    gate = jnp.dot(x.astype(cd), w_gate.astype(cd), preferred_element_type=jnp.float32)
    up = jnp.dot(x.astype(cd), w_up.astype(cd), preferred_element_type=jnp.float32)
    gate = gate * jax.nn.sigmoid(gate)
    gate = jnp.clip(gate, -10.0, 10.0)
    up = jnp.clip(up, -10.0, 10.0)
    hidden = jnp.clip(gate * up, -10.0, 10.0)
    return jnp.dot(hidden.astype(cd), w_down.astype(cd),
                   preferred_element_type=jnp.float32).astype(x.dtype)


if __name__ == "__main__":
    # Small but tiling-friendly shapes: M = 2*64 = 128 tokens, H = 256, I = 1024.
    batch, seq, hidden_size, intermediate_size = 2, 64, 256, 1024

    key = jax.random.PRNGKey(0)
    kx, kg, ku, kd = jax.random.split(key, 4)

    x = jax.random.normal(kx, (batch, seq, hidden_size), jnp.float32)
    w_gate = _xavier_uniform(kg, hidden_size, intermediate_size)   # (H, I)
    w_up = _xavier_uniform(ku, hidden_size, intermediate_size)     # (H, I)
    w_down = _xavier_uniform(kd, intermediate_size, hidden_size)   # (I, H)

    # One-time setup: fuse/cast weights and plan tiles for this chip generation.
    params = prepare_llama_mlp(w_gate, w_up, w_down, M_hint=batch * seq)

    out = llama_mlp_pallas(x, params["w_gu"], params["w_d"],
                           tm=params["tm"], ti=params["ti"],
                           vmem_limit_bytes=params["vmem_limit"])
    out = jax.block_until_ready(out)

    assert out.shape == (batch, seq, hidden_size)

    # Tight check against a bf16-matmul / f32-accumulation reference (same numerics).
    ref_bf16 = _reference(x, w_gate, w_up, w_down, compute_dtype=jnp.bfloat16)
    assert jnp.allclose(out, ref_bf16, atol=1e-2, rtol=1e-2), "mismatch vs bf16-matched reference"

    # Loose sanity check against the full-f32 reference (bf16 matmul rounding only).
    ref_f32 = _reference(x, w_gate, w_up, w_down, compute_dtype=jnp.float32)
    assert jnp.allclose(out, ref_f32, atol=0.15, rtol=0.15), "mismatch vs f32 reference"

    print("KERNEL_OK")
</pallas_src>

<mosaic_0001>
module attributes {stable_mosaic.version = 11 : i64} {
  func.func @_mlp_kernel(%arg0: i32, %arg1: i32, %arg2: memref<128x256xbf16, #tpu.memory_space<vmem>>, %arg3: memref<256x1024xbf16, #tpu.memory_space<vmem>>, %arg4: memref<512x256xbf16, #tpu.memory_space<vmem>>, %arg5: memref<128x256xf32, #tpu.memory_space<vmem>>, %arg6: memref<128x256xf32, #tpu.memory_space<vmem>>) attributes {dimension_semantics = [#tpu.dimension_semantics<parallel>, #tpu.dimension_semantics<arbitrary>], iteration_bounds = array<i64: 1, 2>, scalar_prefetch = 0 : i64, scratch_operands = 1 : i64, tpu.core_type = #tpu.core_type<tc>, window_params = [{transform_indices = @transform_0, window_bounds = array<i64: 128, 256>}, {transform_indices = @transform_1, window_bounds = array<i64: 256, 1024>}, {transform_indices = @transform_2, window_bounds = array<i64: 512, 256>}, {transform_indices = @transform_3, window_bounds = array<i64: 128, 256>}]} {
    %c0 = arith.constant 0 : index
    %c0_0 = arith.constant 0 : index
    %0 = vector.load %arg2[%c0, %c0_0] : memref<128x256xbf16, #tpu.memory_space<vmem>>, vector<128x256xbf16>
    %c0_1 = arith.constant 0 : index
    %c0_2 = arith.constant 0 : index
    %1 = vector.load %arg3[%c0_1, %c0_2] : memref<256x1024xbf16, #tpu.memory_space<vmem>>, vector<256x1024xbf16>
    %cst = arith.constant dense<0.000000e+00> : vector<128x1024xf32>
    %2 = tpu.matmul %0, %1, %cst {dimension_numbers = #tpu.dot_dimension_numbers<[1], [0], [0], [1], [0, 0, 1, 1], [], []>} : vector<128x256xbf16>, vector<256x1024xbf16>, vector<128x1024xf32> -> vector<128x1024xf32>
    %3 = vector.extract_strided_slice %2 {offsets = [0, 0], sizes = [128, 512], strides = [1, 1]} : vector<128x1024xf32> to vector<128x512xf32>
    %4 = vector.extract_strided_slice %2 {offsets = [0, 512], sizes = [128, 512], strides = [1, 1]} : vector<128x1024xf32> to vector<128x512xf32>
    %5 = arith.negf %3 : vector<128x512xf32>
    %6 = math.exp %5 : vector<128x512xf32>
    %cst_3 = arith.constant 1.000000e+00 : f32
    %7 = vector.broadcast %cst_3 : f32 to vector<128x512xf32>
    %8 = arith.addf %7, %6 : vector<128x512xf32>
    %9 = arith.divf %7, %8 : vector<128x512xf32>
    %10 = arith.mulf %3, %9 : vector<128x512xf32>
    %cst_4 = arith.constant -1.000000e+01 : f32
    %cst_5 = arith.constant 1.000000e+01 : f32
    %11 = vector.broadcast %cst_4 : f32 to vector<128x512xf32>
    %12 = arith.maximumf %11, %10 : vector<128x512xf32>
    %13 = vector.broadcast %cst_5 : f32 to vector<128x512xf32>
    %14 = arith.minimumf %13, %12 : vector<128x512xf32>
    %cst_6 = arith.constant -1.000000e+01 : f32
    %cst_7 = arith.constant 1.000000e+01 : f32
    %15 = vector.broadcast %cst_6 : f32 to vector<128x512xf32>
    %16 = arith.maximumf %15, %4 : vector<128x512xf32>
    %17 = vector.broadcast %cst_7 : f32 to vector<128x512xf32>
    %18 = arith.minimumf %17, %16 : vector<128x512xf32>
    %19 = arith.mulf %14, %18 : vector<128x512xf32>
    %cst_8 = arith.constant -1.000000e+01 : f32
    %cst_9 = arith.constant 1.000000e+01 : f32
    %20 = vector.broadcast %cst_8 : f32 to vector<128x512xf32>
    %21 = arith.maximumf %20, %19 : vector<128x512xf32>
    %22 = vector.broadcast %cst_9 : f32 to vector<128x512xf32>
    %23 = arith.minimumf %22, %21 : vector<128x512xf32>
    %24 = arith.truncf %23 : vector<128x512xf32> to vector<128x512xbf16>
    %c0_10 = arith.constant 0 : index
    %c0_11 = arith.constant 0 : index
    %25 = vector.load %arg4[%c0_10, %c0_11] : memref<512x256xbf16, #tpu.memory_space<vmem>>, vector<512x256xbf16>
    %cst_12 = arith.constant dense<0.000000e+00> : vector<128x256xf32>
    %26 = tpu.matmul %24, %25, %cst_12 {dimension_numbers = #tpu.dot_dimension_numbers<[1], [0], [0], [1], [0, 0, 1, 1], [], []>} : vector<128x512xbf16>, vector<512x256xbf16>, vector<128x256xf32> -> vector<128x256xf32>
    %c0_i32 = arith.constant 0 : i32
    %27 = arith.cmpi eq, %arg1, %c0_i32 : i32
    %28 = arith.extui %27 : i1 to i32
    %c0_i32_13 = arith.constant 0 : i32
    %29 = arith.cmpi ne, %28, %c0_i32_13 : i32
    scf.if %29 {
      %c0_17 = arith.constant 0 : index
      %c0_18 = arith.constant 0 : index
      %36 = vector.load %arg6[%c0_17, %c0_18] : memref<128x256xf32, #tpu.memory_space<vmem>>, vector<128x256xf32>
      tpu.vector_store %arg6[%c0_17, %c0_18], %26 {strides = array<i32>} : memref<128x256xf32, #tpu.memory_space<vmem>>, vector<128x256xf32>,
    } else {
    }
    %c0_i32_14 = arith.constant 0 : i32
    %30 = arith.cmpi sgt, %arg1, %c0_i32_14 : i32
    %31 = arith.extui %30 : i1 to i32
    %c0_i32_15 = arith.constant 0 : i32
    %32 = arith.cmpi ne, %31, %c0_i32_15 : i32
    scf.if %32 {
      %c0_17 = arith.constant 0 : index
      %c0_18 = arith.constant 0 : index
      %36 = vector.load %arg6[%c0_17, %c0_18] : memref<128x256xf32, #tpu.memory_space<vmem>>, vector<128x256xf32>
      %37 = arith.addf %36, %26 : vector<128x256xf32>
      %c0_19 = arith.constant 0 : index
      %c0_20 = arith.constant 0 : index
      %38 = vector.load %arg6[%c0_19, %c0_20] : memref<128x256xf32, #tpu.memory_space<vmem>>, vector<128x256xf32>
      tpu.vector_store %arg6[%c0_19, %c0_20], %37 {strides = array<i32>} : memref<128x256xf32, #tpu.memory_space<vmem>>, vector<128x256xf32>,
    } else {
    }
    %c1_i32 = arith.constant 1 : i32
    %33 = arith.cmpi eq, %arg1, %c1_i32 : i32
    %34 = arith.extui %33 : i1 to i32
    %c0_i32_16 = arith.constant 0 : i32
    %35 = arith.cmpi ne, %34, %c0_i32_16 : i32
    scf.if %35 {
      %c0_17 = arith.constant 0 : index
      %c0_18 = arith.constant 0 : index
      %36 = vector.load %arg6[%c0_17, %c0_18] : memref<128x256xf32, #tpu.memory_space<vmem>>, vector<128x256xf32>
      %c0_19 = arith.constant 0 : index
      %c0_20 = arith.constant 0 : index
      %37 = vector.load %arg5[%c0_19, %c0_20] : memref<128x256xf32, #tpu.memory_space<vmem>>, vector<128x256xf32>
      tpu.vector_store %arg5[%c0_19, %c0_20], %36 {strides = array<i32>} : memref<128x256xf32, #tpu.memory_space<vmem>>, vector<128x256xf32>,
    } else {
    }
    return
  }
  func.func @transform_0(%arg0: i32, %arg1: i32) -> (i32, i32) {
    %c0_i32 = arith.constant 0 : i32
    %c0_i32_0 = arith.constant 0 : i32
    return %arg0, %c0_i32 : i32, i32
  }
  func.func @transform_1(%arg0: i32, %arg1: i32) -> (i32, i32) {
    %c0_i32 = arith.constant 0 : i32
    %c0_i32_0 = arith.constant 0 : i32
    return %c0_i32, %arg1 : i32, i32
  }
  func.func @transform_2(%arg0: i32, %arg1: i32) -> (i32, i32) {
    %c0_i32 = arith.constant 0 : i32
    %c0_i32_0 = arith.constant 0 : i32
    return %arg1, %c0_i32 : i32, i32
  }
  func.func @transform_3(%arg0: i32, %arg1: i32) -> (i32, i32) {
    %c0_i32 = arith.constant 0 : i32
    %c0_i32_0 = arith.constant 0 : i32
    return %arg0, %c0_i32 : i32, i32
  }
}

</mosaic_0001>

<bundles_post_ra>
// kernel: llama_mlp_pallas.1
= control target key start
LH: loop header
LB: loop body
LE: loop exit
PB: predicated region body
PF: predicated region fallthrough
CT: control target
= control target key end

     0   :  { %8 = vsyncpa [#allocation4], 0  ;;  %s5716_s0 = inlined_call_operand.vmem [shape: bf16[128,256], index: 0, kind: input, shape index: {}]   ;;  %s5717_s1 = inlined_call_operand.hbm [shape: bf16[256,2048], index: 1, kind: input, shape index: {}]   ;;  %s5718_s2 = inlined_call_operand.hbm [shape: bf16[1024,256], index: 2, kind: input, shape index: {}]   ;;  %s5719_s3 = inlined_call_operand.hbm [shape: f32[128,256], index: 3, kind: output, shape index: {}]  }
   0x1   :  { %10 = vsyncpa [#allocation4 + $0x1], 0 }
   0x2   :  { %11 = vsyncpa [#allocation7], 0 }
   0x3   :  { %13 = vsyncpa [#allocation7 + $0x1], 0 }
   0x4   :  { %14 = vsyncpa [#allocation5], 0  ;;  %s4580_s12 = smov 0   ;;  %s4582_s13 = smov 0  }
   0x5   :  { %s4584_s14 = smov 0   ;;  %s4586_s15 = smov 0  }
   0x6   :  { %s4588_s16 = smov 0   ;;  %s4590_s17 = smov 0  }
   0x7 LB: > { %s3433_s18 = sadd.s32 4294967295, %s4548_s17   ;;  %s29_s19 = sadd.s32 1, %s4544_s16  ;;  %s4548_s17 = sphi %s4590_s17, %s20_s17   ;;  %s4544_s16 = sphi %s4588_s16, %s5732_s16   ;;  %s4540_s15 = sphi %s4586_s15, %s5731_s15   ;;  %s4536_s14 = sphi %s4584_s14, %s5730_s14   ;;  %s4532_s13 = sphi %s4582_s13, %s5729_s13   ;;  %s4528_s12 = sphi %s4580_s12, %s5728_s12  }
   0x8   : > { %p30_p0 = scmp.ge.s32.totalorder %s29_s19, 2  ;;  %s65_s20 = sadd.s32 1, %s4536_s14 }
   0x9   : > { %p72_p1 = scmp.ne.s32.totalorder %s4536_s14, %s4532_s13  ;;  %p73_p2 = scmp.eq.s32.totalorder %s4548_s17, 0 }
   0xa   : > { %s5734_s19 = smov (%p30_p0, %s29_s19), 0  ;;  %p78_p4 = scmp.ne.s32.totalorder %s4532_s13, %s4528_s12 }
   0xb   : > { %p4616_p3 = por %p73_p2, %p72_p1  ;;  %s62_s22 = ssub.s32 %s4544_s16, %s5734_s19 }
   0xc   : > { %p79_p5 = scmp.eq.s32.totalorder %s3433_s18, 0  ;;  %p63_p6 = scmp.eq.s32.totalorder %s62_s22, 0 }
   0xd   : > { %p3968_p8 = scmp.lt.s32.totalorder %s4548_s17, 2  ;;  %s4634_s25 = sand.u32 1, %s4536_s14  }
   0xe   : > { %p4625_p7 = por %p79_p5, %p78_p4  ;;  %s3918_s26 = sshll.u32 %s4544_s16, 9 }
   0xf   : > { %s4631_s24 = scalar_select %p63_p6, %s4536_s14, %s65_s20  }
  0x10   : > { %s5722_s23 = scalar_select %p4625_p7, 1, 0 }
  0x11   : > { %s3437_s27 = sshll.u32 %s4634_s25, 10  ;;  %s4641_s30 = scalar_lea.hbm %s5717_s1, %s3918_s26 }
  0x12   : > { %s168_s4 = scalar_lea.vmem [#allocation3], %s3437_s27  ;;  %p4645_p9 = pnand %p3968_p8, %p4616_p3 }
  0x13   : > { %s175_s5 = sshll.u32 %s168_s4, 4  ;;  %s165_s7 = scalar_lea.sflag [#allocation4], %s4634_s25  ;;  %s4649_s5 = int_to_ptr.vmem [resolvable:$true] %s175_s5 }
  0x14   : > { %s4404_s8 = scalar_lea.hbm %s4641_s30, 16384  ;;  %p4406_p12 = pneg %p4645_p9 }
  0x15   : > { %p4405_p11 = scmp.ne.s32.totalorder %s4641_s30, %s4404_s8  ;;  %s4409_s11 = scalar_lea.hbm %s5717_s1, 32768 }
  0x16   : > { %p4410_p1 = scmp.lt.u32.totalorder %s4641_s30, %s5717_s1  ;;  %p4411_p2 = scmp.lt.u32.totalorder %s4409_s11, %s4404_s8 }
  0x17   : > { %p4407_p13 = pnand %p4406_p12, %p4405_p11  ;;  %p4413_p4 = scmp.lt.u32.totalorder %s4404_s8, %s4641_s30 }
  0x18   : > { %p4412_p3 = por %p4411_p2, %p4410_p1 }
  0x19   : > { %p4408_p0 = pneg %p4407_p13 }
  0x1a   : > { %p4414_p5 = por %p4413_p4, %p4412_p3 }
  0x1c   : > { %p4415_p6 = pnand %p4414_p5, %p4408_p0 }
  0x1e   : > { %4418 = shalt.err (!%p4415_p6)
}
  0x1f   : > { %s4419_s21 = scalar_lea.vmem %s4649_s5, 16384  ;;  %s4550_s22 = smov [#allocation3]  }
  0x20   : > { %p4420_p8 = scmp.ne.s32.totalorder %s4649_s5, %s4419_s21  ;;  %s4424_s26 = sshll.u32 %s4550_s22, 4  ;;  %s4425_s26 = int_to_ptr.vmem [resolvable:$false] %s4424_s26 }
  0x21   : > { %s4426_s27 = scalar_lea.vmem %s4425_s26, 32768  ;;  %p4427_p10 = scmp.lt.s32.totalorder %s4649_s5, %s4425_s26 }
  0x22   : > { %p4422_p11 = pnand %p4420_p8, %p4406_p12  ;;  %p4428_p1 = scmp.lt.s32.totalorder %s4426_s27, %s4419_s21 }
  0x24   : > { %p4423_p13 = pneg %p4422_p11  ;;  %p4429_p2 = por %p4428_p1, %p4427_p10 }
  0x26   : > { %p4430_p3 = pnand %p4429_p2, %p4423_p13 }
  0x28   : > { %4433 = shalt.err (!%p4430_p3)
}
  0x29   : > { %s4551_s28 = smov 1024   ;;  %s4552_s29 = smov 512  }
  0x2a   : > { %s4553_s4 = smov 32   ;;  %p205_p0 = scmp.lt.s32.totalorder %s4548_s17, 3 }
  0x2b   : > { %3964 = dma.hbm_to_vmem [thread:$0]  (!%p4645_p9), %s4641_s30, 16384, %s4649_s5, %s165_s7, %s4551_s28, %s4552_s29, %s4553_s4  }
  0x2c   : > { %s3440_s8 = sshll.u32 %s4634_s25, 9  ;;  %s3920_s9 = sshll.u32 %s4544_s16, 13 }
  0x2d   : > { %p5724_p10 = scmp.ge.s32.totalorder %s4548_s17, 1  ;;  %s4692_s20 = scalar_lea.hbm %s5718_s2, %s3920_s9 }
  0x2e   : > { %s189_s21 = scalar_lea.vmem [#allocation6], %s3440_s8  ;;  %s186_s30 = scalar_lea.sflag [#allocation7], %s4634_s25 }
  0x2f   : > { %p4685_p4 = pnand %p5724_p10, %p205_p0  ;;  %s197_s22 = sshll.u32 %s189_s21, 4  ;;  %s4694_s22 = int_to_ptr.vmem [resolvable:$true] %s197_s22 }
  0x30   : > { %s4434_s5 = scalar_lea.hbm %s4692_s20, 8192  ;;  %s4439_s27 = scalar_lea.hbm %s5718_s2, 16384 }
  0x31   : > { %p4435_p5 = scmp.ne.s32.totalorder %s4692_s20, %s4434_s5  ;;  %p4440_p11 = scmp.lt.u32.totalorder %s4692_s20, %s5718_s2 }
  0x32   : > { %p4441_p13 = scmp.lt.u32.totalorder %s4439_s27, %s4434_s5  ;;  %p4443_p2 = scmp.lt.u32.totalorder %s4434_s5, %s4692_s20 }
  0x33   : > { %p4437_p6 = pnand %p4435_p5, %p4406_p12 }
  0x34   : > { %p4442_p1 = por %p4441_p13, %p4440_p11 }
  0x35   : > { %p4438_p8 = pneg %p4437_p6 }
  0x36   : > { %p4444_p3 = por %p4443_p2, %p4442_p1 }
  0x38   : > { %p4445_p0 = pnand %p4444_p3, %p4438_p8 }
  0x3a   : > { %4448 = shalt.err (!%p4445_p0)
}
  0x3b   : > { %s4449_s4 = scalar_lea.vmem %s4694_s22, 8192  ;;  %s4554_s8 = smov [#allocation6]  }
  0x3c   : > { %p4450_p10 = scmp.ne.s32.totalorder %s4694_s22, %s4449_s4  ;;  %s4454_s9 = sshll.u32 %s4554_s8, 4  ;;  %s4455_s9 = int_to_ptr.vmem [resolvable:$false] %s4454_s9 }
  0x3d   : > { %s4456_s11 = scalar_lea.vmem %s4455_s9, 16384  ;;  %p4457_p7 = scmp.lt.s32.totalorder %s4694_s22, %s4455_s9 }
  0x3e   : > { %p4452_p5 = pnand %p4450_p10, %p4406_p12  ;;  %p4458_p11 = scmp.lt.s32.totalorder %s4456_s11, %s4449_s4 }
  0x40   : > { %p4453_p6 = pneg %p4452_p5  ;;  %p4459_p13 = por %p4458_p11, %p4457_p7 }
  0x42   : > { %p4460_p1 = pnand %p4459_p13, %p4453_p6 }
  0x44   : > { %4463 = shalt.err (!%p4460_p1)
}
  0x45   : > { %s4555_s12 = smov 128   ;;  %s4556_s21 = smov 8  }
  0x46   : > { %3967 = dma.hbm_to_vmem [thread:$0]  (!%p4645_p9), %s4692_s20, 8192, %s4694_s22, %s186_s30, %s4555_s12, %s4555_s12, %s4556_s21  }
  0x47   : > { %209 = sbr.rel (%p4685_p4) target bundleno = 840 (0x348), region = 32  ;;  %s211_s5 = sand.u32 (!%p4685_p4), 1, %s4532_s13  }
  0x48   : > { %s3445_s7 = sshll.u32 (!%p4685_p4), %s211_s5, 10  ;;  %s212_s26 = scalar_lea.sflag (!%p4685_p4), [#allocation4], %s211_s5 }
  0x49   : > { %s4725_s27 = scalar_lea.vmem (!%p4685_p4), [#allocation3], %s3445_s7  ;;  %p5726_p7 = scmp.ne.s32.totalorder (!%p4685_p4), %s5722_s23, 0 }
  0x4e   : > { %4515 = dma.done.wait (%p5726_p7), %s212_s26, 16384  }
  0x4f   : > { %4517 = vsyncadd (%p5726_p7), %s212_s26, 4294950912  ;;  %s3446_s28 = sshll.u32 %s211_s5, 9  ;;  %s221_s6 = scalar_lea.sflag [#allocation7], %s211_s5 }
  0x50   : > { %s4731_s25 = scalar_lea.vmem [#allocation6], %s3446_s28 }
  0x51   : > { %4519 = dma.done.wait (%p5726_p7), %s221_s6, 8192  }
  0x52   : > { %4521 = vsyncadd (%p5726_p7), %s221_s6, 4294959104  ;;  %v279_v0 = vld [vmem:[%s4725_s27] sm:$0xff]  ;;  %v281_v11 = vld [vmem:[%s4725_s27 + $0x10] sm:$0xff]  ;;  %p3911_p9 = scmp.ne.s32.totalorder %s4540_s15, 0 }
  0x53   : > { %v283_v1 = vld [vmem:[%s4725_s27 + $0x20] sm:$0xff]  ;;  %v285_v12 = vld [vmem:[%s4725_s27 + $0x30] sm:$0xff] }
  0x54   : > { %v287_v2 = vld [vmem:[%s4725_s27 + $0x40] sm:$0xff]  ;;  %v3464_v3 = vcombine.high %v279_v0, %v283_v1  ;;  %v3463_v4 = vcombine.low %v279_v0, %v283_v1  ;;  %v3468_v15 = vcombine.high %v281_v11, %v285_v12  ;;  %v3467_v16 = vcombine.low %v281_v11, %v285_v12  ;;  %v289_v17 = vld [vmem:[%s4725_s27 + $0x50] sm:$0xff] }
  0x55   : > { %v291_v5 = vld [vmem:[%s4725_s27 + $0x60] sm:$0xff]  ;;  %v293_v18 = vld [vmem:[%s4725_s27 + $0x70] sm:$0xff] }
  0x56   : > { %v3472_v6 = vcombine.high %v287_v2, %v291_v5  ;;  %v295_v7 = vld [vmem:[%s4725_s27 + $0x80] sm:$0xff]  ;;  %1127 = vmatprep.subr.bf16.mxu1 %v3464_v3  ;;  %v3471_v9 = vcombine.low %v287_v2, %v291_v5  ;;  %1353 = vmatprep.subr.bf16.mxu0 %v3468_v15  ;;  %v3476_v20 = vcombine.high %v289_v17, %v293_v18  ;;  %v297_v21 = vld [vmem:[%s4725_s27 + $0x90] sm:$0xff] }
  0x57   : > { %v299_v8 = vld [vmem:[%s4725_s27 + $0xa0] sm:$0xff]  ;;  %1128 = vmatpush1.bf16.msra.mxu1 %v3463_v4  ;;  %v301_v22 = vld [vmem:[%s4725_s27 + $0xb0] sm:$0xff]  ;;  %1354 = vmatpush1.bf16.msra.mxu0 %v3467_v16  ;;  %v3475_v24 = vcombine.low %v289_v17, %v293_v18 }
  0x58   : > { %1129 = vmatprep.subr.bf16.mxu1 %v3472_v6  ;;  %v3480_v10 = vcombine.high %v295_v7, %v299_v8  ;;  %v303_v13 = vld [vmem:[%s4725_s27 + $0xc0] sm:$0xff]  ;;  %v3479_v19 = vcombine.low %v295_v7, %v299_v8  ;;  %1355 = vmatprep.subr.bf16.mxu0 %v3476_v20  ;;  %v3484_v27 = vcombine.high %v297_v21, %v301_v22  ;;  %v305_v28 = vld [vmem:[%s4725_s27 + $0xd0] sm:$0xff] }
  0x59   : > { %v307_v14 = vld [vmem:[%s4725_s27 + $0xe0] sm:$0xff]  ;;  %v309_v29 = vld [vmem:[%s4725_s27 + $0xf0] sm:$0xff]  ;;  %v3483_v32 = vcombine.low %v297_v21, %v301_v22 }
  0x5a   : > { %v3488_v23 = vcombine.high %v303_v13, %v307_v14  ;;  %v311_v25 = vld [vmem:[%s4725_s27 + $0x100] sm:$0xff]  ;;  %v3487_v30 = vcombine.low %v303_v13, %v307_v14  ;;  %v3492_v35 = vcombine.high %v305_v28, %v309_v29  ;;  %v313_v36 = vld [vmem:[%s4725_s27 + $0x110] sm:$0xff]  ;;  %v3491_v40 = vcombine.low %v305_v28, %v309_v29 }
  0x5b   : > { %1130 = vmatpush1.bf16.msra.mxu1 %v3471_v9  ;;  %v315_v26 = vld [vmem:[%s4725_s27 + $0x120] sm:$0xff]  ;;  %1356 = vmatpush1.bf16.msra.mxu0 %v3475_v24  ;;  %v317_v37 = vld [vmem:[%s4725_s27 + $0x130] sm:$0xff] }
  0x5c   : > { %1131 = vmatprep.subr.bf16.mxu1 %v3480_v10  ;;  %v3496_v31 = vcombine.high %v311_v25, %v315_v26  ;;  %v319_v33 = vld [vmem:[%s4725_s27 + $0x140] sm:$0xff]  ;;  %1357 = vmatprep.subr.bf16.mxu0 %v3484_v27  ;;  %v3495_v38 = vcombine.low %v311_v25, %v315_v26  ;;  %v3500_v44 = vcombine.high %v313_v36, %v317_v37  ;;  %v321_v45 = vld [vmem:[%s4725_s27 + $0x150] sm:$0xff] }
  0x5d   : > { %v323_v34 = vld [vmem:[%s4725_s27 + $0x160] sm:$0xff]  ;;  %v325_v46 = vld [vmem:[%s4725_s27 + $0x170] sm:$0xff]  ;;  %v3499_v49 = vcombine.low %v313_v36, %v317_v37 }
  0x5e   : > { %v3504_v39 = vcombine.high %v319_v33, %v323_v34  ;;  %v4762_v41 = vld [vmem:[%s5716_s0 + $0x4] ss:$8 sps:$4 sm:$0xff]   ;;  %v3503_v47 = vcombine.low %v319_v33, %v323_v34  ;;  %v3508_v52 = vcombine.high %v321_v45, %v325_v46  ;;  %v329_v53 = vld [vmem:[%s4725_s27 + $0x190] sm:$0xff]  ;;  %v3507_v57 = vcombine.low %v321_v45, %v325_v46 }
  0x5f   : > { %1132 = vmatpush1.bf16.msra.mxu1 %v3479_v19  ;;  %1358 = vmatpush1.bf16.msra.mxu0 %v3483_v32  ;;  %v327_v42 = vld [vmem:[%s4725_s27 + $0x180] sm:$0xff]  ;;  %v333_v54 = vld [vmem:[%s4725_s27 + $0x1b0] sm:$0xff] }
  0x60   : > { %1133 = vmatprep.subr.bf16.mxu1 %v3488_v23  ;;  %v331_v43 = vld [vmem:[%s4725_s27 + $0x1a0] sm:$0xff]  ;;  %1359 = vmatprep.subr.bf16.mxu0 %v3492_v35  ;;  %v3516_v60 = vcombine.high %v329_v53, %v333_v54  ;;  %v337_v61 = vld [vmem:[%s4725_s27 + $0x1d0] sm:$0xff]  ;;  %v3515_v1 = vcombine.low %v329_v53, %v333_v54 }
  0x61   : > { %1159 = vmatprep.mubr.bf16.mxu1 %v4762_v41  ;;  %1385 = vmatprep.mubr.bf16.mxu0 %v4762_v41  ;;  %v3512_v48 = vcombine.high %v327_v42, %v331_v43  ;;  %v335_v50 = vld [vmem:[%s4725_s27 + $0x1c0] sm:$0xff]  ;;  %v3511_v55 = vcombine.low %v327_v42, %v331_v43  ;;  %v341_v62 = vld [vmem:[%s4725_s27 + $0x1f0] sm:$0xff] }
  0x62   : > { %v339_v51 = vld [vmem:[%s4725_s27 + $0x1e0] sm:$0xff]  ;;  %v3524_v4 = vcombine.high %v337_v61, %v341_v62  ;;  %v345_v5 = vld [vmem:[%s4725_s27 + $0x210] sm:$0xff]  ;;  %v3523_v9 = vcombine.low %v337_v61, %v341_v62 }
  0x63   : > { %1134 = vmatpush1.bf16.msra.mxu1 %v3487_v30  ;;  %1360 = vmatpush1.bf16.msra.mxu0 %v3491_v40  ;;  %v3520_v56 = vcombine.high %v335_v50, %v339_v51  ;;  %v343_v58 = vld [vmem:[%s4725_s27 + $0x200] sm:$0xff]  ;;  %v3519_v63 = vcombine.low %v335_v50, %v339_v51  ;;  %v349_v6 = vld [vmem:[%s4725_s27 + $0x230] sm:$0xff] }
  0x64   : > { %1135 = vmatprep.subr.bf16.mxu1 %v3496_v31  ;;  %1361 = vmatprep.subr.bf16.mxu0 %v3500_v44  ;;  %v347_v59 = vld [vmem:[%s4725_s27 + $0x220] sm:$0xff]  ;;  %v3532_v12 = vcombine.high %v345_v5, %v349_v6  ;;  %v353_v13 = vld [vmem:[%s4725_s27 + $0x250] sm:$0xff]  ;;  %v3531_v17 = vcombine.low %v345_v5, %v349_v6 }
  0x65   : > { %v3528_v0 = vcombine.high %v343_v58, %v347_v59  ;;  %v351_v2 = vld [vmem:[%s4725_s27 + $0x240] sm:$0xff]  ;;  %v3527_v7 = vcombine.low %v343_v58, %v347_v59  ;;  %v357_v14 = vld [vmem:[%s4725_s27 + $0x270] sm:$0xff]  ;;  %v284_v58 = vld [vmem:[%s4725_s27 + $0x28] sm:$0xff] }
  0x66   : > { %v355_v3 = vld [vmem:[%s4725_s27 + $0x260] sm:$0xff]  ;;  %v3540_v20 = vcombine.high %v353_v13, %v357_v14  ;;  %v361_v21 = vld [vmem:[%s4725_s27 + $0x290] sm:$0xff]  ;;  %v3539_v25 = vcombine.low %v353_v13, %v357_v14  ;;  %v304_v14 = vld [vmem:[%s4725_s27 + $0xc8] sm:$0xff] }
  0x67   : > { %1136 = vmatpush1.bf16.msra.mxu1 %v3495_v38  ;;  %1362 = vmatpush1.bf16.msra.mxu0 %v3499_v49  ;;  %v3536_v8 = vcombine.high %v351_v2, %v355_v3  ;;  %v359_v10 = vld [vmem:[%s4725_s27 + $0x280] sm:$0xff]  ;;  %v3535_v15 = vcombine.low %v351_v2, %v355_v3  ;;  %v365_v22 = vld [vmem:[%s4725_s27 + $0x2b0] sm:$0xff]  ;;  %v292_v2 = vld [vmem:[%s4725_s27 + $0x68] sm:$0xff] }
  0x68   : > { %1137 = vmatprep.subr.bf16.mxu1 %v3504_v39  ;;  %1363 = vmatprep.subr.bf16.mxu0 %v3508_v52  ;;  %v363_v11 = vld [vmem:[%s4725_s27 + $0x2a0] sm:$0xff]  ;;  %v3548_v28 = vcombine.high %v361_v21, %v365_v22  ;;  %v369_v29 = vld [vmem:[%s4725_s27 + $0x2d0] sm:$0xff]  ;;  %v3547_v33 = vcombine.low %v361_v21, %v365_v22  ;;  %v316_v22 = vld [vmem:[%s4725_s27 + $0x128] sm:$0xff] }
  0x69   : > { %v3544_v16 = vcombine.high %v359_v10, %v363_v11  ;;  %v367_v18 = vld [vmem:[%s4725_s27 + $0x2c0] sm:$0xff]  ;;  %v3543_v23 = vcombine.low %v359_v10, %v363_v11  ;;  %v373_v30 = vld [vmem:[%s4725_s27 + $0x2f0] sm:$0xff]  ;;  %v300_v10 = vld [vmem:[%s4725_s27 + $0xa8] sm:$0xff] }
  0x6a   : > { %v371_v19 = vld [vmem:[%s4725_s27 + $0x2e0] sm:$0xff]  ;;  %v3556_v36 = vcombine.high %v369_v29, %v373_v30  ;;  %v377_v37 = vld [vmem:[%s4725_s27 + $0x310] sm:$0xff]  ;;  %v3555_v42 = vcombine.low %v369_v29, %v373_v30 }
  0x6b   : > { %1138 = vmatpush1.bf16.msra.mxu1 %v3503_v47  ;;  %1364 = vmatpush1.bf16.msra.mxu0 %v3507_v57  ;;  %v3552_v24 = vcombine.high %v367_v18, %v371_v19  ;;  %v375_v26 = vld [vmem:[%s4725_s27 + $0x300] sm:$0xff]  ;;  %v3551_v31 = vcombine.low %v367_v18, %v371_v19  ;;  %v381_v38 = vld [vmem:[%s4725_s27 + $0x330] sm:$0xff]  ;;  %v280_v57 = vld [vmem:[%s4725_s27 + $0x8] sm:$0xff] }
  0x6c   : > { %1139 = vmatprep.subr.bf16.mxu1 %v3512_v48  ;;  %1365 = vmatprep.subr.bf16.mxu0 %v3516_v60  ;;  %v379_v27 = vld [vmem:[%s4725_s27 + $0x320] sm:$0xff]  ;;  %v3564_v45 = vcombine.high %v377_v37, %v381_v38  ;;  %v385_v46 = vld [vmem:[%s4725_s27 + $0x350] sm:$0xff]  ;;  %v3563_v52 = vcombine.low %v377_v37, %v381_v38 }
  0x6d   : > { %v3560_v32 = vcombine.high %v375_v26, %v379_v27  ;;  %v383_v34 = vld [vmem:[%s4725_s27 + $0x340] sm:$0xff]  ;;  %v3559_v39 = vcombine.low %v375_v26, %v379_v27  ;;  %v389_v47 = vld [vmem:[%s4725_s27 + $0x370] sm:$0xff]  ;;  %v324_v26 = vld [vmem:[%s4725_s27 + $0x168] sm:$0xff] }
  0x6e   : > { %v387_v35 = vld [vmem:[%s4725_s27 + $0x360] sm:$0xff]  ;;  %v393_v53 = vld [vmem:[%s4725_s27 + $0x390] sm:$0xff]  ;;  %v3571_v60 = vcombine.low %v385_v46, %v389_v47 }
  0x6f   : > { %1140 = vmatpush1.bf16.msra.mxu1 %v3511_v55  ;;  %1366 = vmatpush1.bf16.msra.mxu0 %v3515_v1  ;;  %v3568_v40 = vcombine.high %v383_v34, %v387_v35  ;;  %v391_v43 = vld [vmem:[%s4725_s27 + $0x380] sm:$0xff]  ;;  %v3567_v48 = vcombine.low %v383_v34, %v387_v35  ;;  %v397_v54 = vld [vmem:[%s4725_s27 + $0x3b0] sm:$0xff]  ;;  %v3572_v55 = vcombine.high %v385_v46, %v389_v47  ;;  %v288_v1 = vld [vmem:[%s4725_s27 + $0x48] sm:$0xff] }
  0x70   : > { %1141 = vmatprep.subr.bf16.mxu1 %v3520_v56  ;;  %1367 = vmatprep.subr.bf16.mxu0 %v3524_v4  ;;  %v395_v44 = vld [vmem:[%s4725_s27 + $0x3a0] sm:$0xff]  ;;  %v401_v61 = vld [vmem:[%s4725_s27 + $0x3d0] sm:$0xff]  ;;  %v3466_v4 = vcombine.high %v280_v57, %v284_v58  ;;  %v3579_v5 = vcombine.low %v393_v53, %v397_v54  ;;  %v3474_v11 = vcombine.high %v288_v1, %v292_v2  ;;  %v336_v35 = vld [vmem:[%s4725_s27 + $0x1c8] sm:$0xff] }
  0x71   : > { %v399_v49 = vld [vmem:[%s4725_s27 + $0x3c0] sm:$0xff]  ;;  %v3576_v51 = vcombine.high %v391_v43, %v395_v44  ;;  %v3575_v56 = vcombine.low %v391_v43, %v395_v44  ;;  %v405_v62 = vld [vmem:[%s4725_s27 + $0x3f0] sm:$0xff]  ;;  %v3473_v13 = vcombine.low %v288_v1, %v292_v2  ;;  %v348_v43 = vld [vmem:[%s4725_s27 + $0x228] sm:$0xff] }
  0x72   : > { %v403_v50 = vld [vmem:[%s4725_s27 + $0x3e0] sm:$0xff]  ;;  %v4820_v6 = vld [vmem:[%s5716_s0 + $0x14] ss:$8 sps:$4 sm:$0xff]   ;;  %v4867_v37 = vld [vmem:[%s5716_s0 + $0x30] ss:$8 sps:$4 sm:$0xff]  }
  0x73   : > { %1142 = vmatpush1.bf16.msra.mxu1 %v3519_v63  ;;  %1368 = vmatpush1.bf16.msra.mxu0 %v3523_v9  ;;  %v3584_v59 = vcombine.high %v399_v49, %v403_v50  ;;  %v3580_v63 = vcombine.high %v393_v53, %v397_v54  ;;  %v4815_v3 = vld [vmem:[%s5716_s0] ss:$8 sps:$4 sm:$0xff]   ;;  %v4836_v18 = vld [vmem:[%s5716_s0 + $0x24] ss:$8 sps:$4 sm:$0xff]   ;;  %v4854_v29 = vld [vmem:[%s5716_s0 + $0x34] ss:$8 sps:$4 sm:$0xff]  }
  0x74   : > { %1143 = vmatprep.subr.bf16.mxu1 %v3528_v0  ;;  %1369 = vmatprep.subr.bf16.mxu0 %v3532_v12  ;;  %v3583_v0 = vcombine.low %v399_v49, %v403_v50  ;;  %v296_v9 = vld [vmem:[%s4725_s27 + $0x88] sm:$0xff]  ;;  %v3587_v12 = vcombine.low %v401_v61, %v405_v62  ;;  %v4890_v50 = vld [vmem:[%s5716_s0 + $0x54] ss:$8 sps:$4 sm:$0xff]  }
  0x75   : > { %v3481_v19 = vcombine.low %v296_v9, %v300_v10  ;;  %v4849_v27 = vld [vmem:[%s5716_s0 + $0x20] ss:$8 sps:$4 sm:$0xff]  }
  0x76   : > { %v352_v46 = vld [vmem:[%s4725_s27 + $0x248] sm:$0xff] }
  0x77   : > { %1144 = vmatpush1.bf16.msra.mxu1 %v3527_v7  ;;  %1370 = vmatpush1.bf16.msra.mxu0 %v3531_v17  ;;  %v3588_v7 = vcombine.high %v401_v61, %v405_v62  ;;  %v3482_v17 = vcombine.high %v296_v9, %v300_v10  ;;  %v356_v47 = vld [vmem:[%s4725_s27 + $0x268] sm:$0xff] }
  0x78   : > { %1145 = vmatprep.subr.bf16.mxu1 %v3536_v8  ;;  %1371 = vmatprep.subr.bf16.mxu0 %v3540_v20  ;;  %v3465_v8 = vcombine.low %v280_v57, %v284_v58  ;;  %v312_v20 = vld [vmem:[%s4725_s27 + $0x108] sm:$0xff]  ;;  %v3537_v54 = vcombine.low %v352_v46, %v356_v47  ;;  %v4903_v58 = vld [vmem:[%s5716_s0 + $0x50] ss:$8 sps:$4 sm:$0xff]  }
  0x79   : > { %v364_v53 = vld [vmem:[%s4725_s27 + $0x2a8] sm:$0xff] }
  0x7a   : > { %v372_v57 = vld [vmem:[%s4725_s27 + $0x2e8] sm:$0xff] }
  0x7b   : > { %1146 = vmatpush1.bf16.msra.mxu1 %v3535_v15  ;;  %1372 = vmatpush1.bf16.msra.mxu0 %v3539_v25  ;;  %v308_v15 = vld [vmem:[%s4725_s27 + $0xe8] sm:$0xff] }
  0x7c   : > { %1147 = vmatprep.subr.bf16.mxu1 %v3544_v16  ;;  %1373 = vmatprep.subr.bf16.mxu0 %v3548_v28  ;;  %v4831_v16 = vld [vmem:[%s5716_s0 + $0x10] ss:$8 sps:$4 sm:$0xff]   ;;  %v3490_v21 = vcombine.high %v304_v14, %v308_v15  ;;  %v320_v25 = vld [vmem:[%s4725_s27 + $0x148] sm:$0xff]  ;;  %v3497_v28 = vcombine.low %v312_v20, %v316_v22 }
  0x7d   : > { %v3506_v30 = vcombine.high %v320_v25, %v324_v26  ;;  %v376_v62 = vld [vmem:[%s4725_s27 + $0x308] sm:$0xff] }
  0x7e   : > { %v384_v2 = vld [vmem:[%s4725_s27 + $0x348] sm:$0xff] }
  0x7f   : > { %1148 = vmatpush1.bf16.msra.mxu1 %v3543_v23  ;;  %1374 = vmatpush1.bf16.msra.mxu0 %v3547_v33  ;;  %v3489_v23 = vcombine.low %v304_v14, %v308_v15  ;;  %v3505_v33 = vcombine.low %v320_v25, %v324_v26  ;;  %v392_v10 = vld [vmem:[%s4725_s27 + $0x388] sm:$0xff]  ;;  %v4056_v26 = vld [vmem:[%s4731_s25 + $0x14] ss:$8 sps:$4 sm:$0xff]  }
  0x80   : > { %1149 = vmatprep.subr.bf16.mxu1 %v3552_v24  ;;  %1375 = vmatprep.subr.bf16.mxu0 %v3556_v36  ;;  %v3498_v24 = vcombine.high %v312_v20, %v316_v22  ;;  %v340_v36 = vld [vmem:[%s4725_s27 + $0x1e8] sm:$0xff]  ;;  %v286_v22 = vld [vmem:[%s4725_s27 + $0x38] sm:$0xff] }
  0x81   : > { %v3521_v44 = vcombine.low %v336_v35, %v340_v36  ;;  %v400_v14 = vld [vmem:[%s4725_s27 + $0x3c8] sm:$0xff] }
  0x82   : > { %v404_v15 = vld [vmem:[%s4725_s27 + $0x3e8] sm:$0xff] }
  0x83   : > { %1150 = vmatpush1.bf16.msra.mxu1 %v3551_v31  ;;  %1376 = vmatpush1.bf16.msra.mxu0 %v3555_v42  ;;  %v328_v31 = vld [vmem:[%s4725_s27 + $0x188] sm:$0xff]  ;;  %v3586_v20 = vcombine.high %v400_v14, %v404_v15  ;;  %v3585_v25 = vcombine.low %v400_v14, %v404_v15  ;;  %v4074_v15 = vld [vmem:[%s4731_s25 + $0x74] ss:$8 sps:$4 sm:$0xff]  }
  0x84   : > { %1151 = vmatprep.subr.bf16.mxu1 %v3560_v32  ;;  %1377 = vmatprep.subr.bf16.mxu0 %v3564_v45  ;;  %v332_v32 = vld [vmem:[%s4725_s27 + $0x1a8] sm:$0xff] }
  0x85   : > { %v3514_v34 = vcombine.high %v328_v31, %v332_v32  ;;  %v3513_v38 = vcombine.low %v328_v31, %v332_v32  ;;  %v344_v42 = vld [vmem:[%s4725_s27 + $0x208] sm:$0xff]  ;;  %v294_v31 = vld [vmem:[%s4725_s27 + $0x78] sm:$0xff] }
  0x86   : > { %v3530_v45 = vcombine.high %v344_v42, %v348_v43  ;;  %v3529_v49 = vcombine.low %v344_v42, %v348_v43  ;;  %v4054_v32 = vld [vmem:[%s4731_s25 + $0x10] ss:$8 sps:$4 sm:$0xff]  }
  0x87   : > { %1152 = vmatpush1.bf16.msra.mxu1 %v3559_v39  ;;  %1378 = vmatpush1.bf16.msra.mxu0 %v3563_v52  ;;  %v4872_v39 = vld [vmem:[%s5716_s0 + $0x44] ss:$8 sps:$4 sm:$0xff]  }
  0x88   : > { %1153 = vmatprep.subr.bf16.mxu1 %v3568_v40  ;;  %1379 = vmatprep.subr.bf16.mxu0 %v3572_v55  ;;  %v3522_v40 = vcombine.high %v336_v35, %v340_v36  ;;  %v360_v52 = vld [vmem:[%s4725_s27 + $0x288] sm:$0xff]  ;;  %v298_v35 = vld [vmem:[%s4725_s27 + $0x98] sm:$0xff] }
  0x89   : > { %v3546_v55 = vcombine.high %v360_v52, %v364_v53  ;;  %v302_v36 = vld [vmem:[%s4725_s27 + $0xb8] sm:$0xff] }
  0x8a   : > { %v3486_v43 = vcombine.high %v298_v35, %v302_v36 }
  0x8b   : > { %1154 = vmatpush1.bf16.msra.mxu1 %v3567_v48  ;;  %1380 = vmatpush1.bf16.msra.mxu0 %v3571_v60  ;;  %v4885_v48 = vld [vmem:[%s5716_s0 + $0x40] ss:$8 sps:$4 sm:$0xff]   ;;  %v4908_v60 = vld [vmem:[%s5716_s0 + $0x64] ss:$8 sps:$4 sm:$0xff]  }
  0x8c   : > { %1155 = vmatprep.subr.bf16.mxu1 %v3576_v51  ;;  %1381 = vmatprep.subr.bf16.mxu0 %v3580_v63  ;;  %v3538_v51 = vcombine.high %v352_v46, %v356_v47  ;;  %v380_v63 = vld [vmem:[%s4725_s27 + $0x328] sm:$0xff]  ;;  %v4060_v46 = vld [vmem:[%s4731_s25 + $0x30] ss:$8 sps:$4 sm:$0xff]  }
  0x8d   : > { %v3562_v1 = vcombine.high %v376_v62, %v380_v63  ;;  %v4065_v47 = vld [vmem:[%s4731_s25 + $0x44] ss:$8 sps:$4 sm:$0xff]  }
  0x8f   : > { %1156 = vmatpush1.bf16.msra.mxu1 %v3575_v56  ;;  %1382 = vmatpush1.bf16.msra.mxu0 %v3579_v5  ;;  %v368_v56 = vld [vmem:[%s4725_s27 + $0x2c8] sm:$0xff] }
  0x90   : > { %1157 = vmatprep.subr.bf16.mxu1 %v3584_v59  ;;  %1383 = vmatprep.subr.bf16.mxu0 %v3588_v7  ;;  %v3545_v59 = vcombine.low %v360_v52, %v364_v53  ;;  %v3554_v61 = vcombine.high %v368_v56, %v372_v57  ;;  %v4921_v5 = vld [vmem:[%s5716_s0 + $0x60] ss:$8 sps:$4 sm:$0xff]   ;;  %v3561_v7 = vcombine.low %v376_v62, %v380_v63  ;;  %v314_v52 = vld [vmem:[%s4725_s27 + $0x118] sm:$0xff] }
  0x91   : > { %v318_v53 = vld [vmem:[%s4725_s27 + $0x138] sm:$0xff] }
  0x92   : > { %v4066_v62 = vld [vmem:[%s4731_s25 + $0x50] ss:$8 sps:$4 sm:$0xff]   ;;  %v3501_v63 = vcombine.low %v314_v52, %v318_v53 }
  0x93   : > { %1158 = vmatpush1.bf16.msra.mxu1 %v3583_v0  ;;  %1384 = vmatpush1.bf16.msra.mxu0 %v3587_v12  ;;  %v3553_v0 = vcombine.low %v368_v56, %v372_v57  ;;  %v3502_v57 = vcombine.high %v314_v52, %v318_v53 }
  0x94   : > { %1240 = vmatprep.subr.bf16.mxu1 %v3466_v4  ;;  %v388_v4 = vld [vmem:[%s4725_s27 + $0x368] sm:$0xff] }
  0x95   : > { %v3570_v9 = vcombine.high %v384_v2, %v388_v4  ;;  %v3569_v12 = vcombine.low %v384_v2, %v388_v4  ;;  %v334_v2 = vld [vmem:[%s4725_s27 + $0x1b8] sm:$0xff] }
  0x96   : > { %1160 = vmatmul.mubr.bf16.vlgmr.msra.gmra.mrb[0].mxu1 %v4815_v3  ;;  %1386 = vmatmul.mubr.bf16.vlgmr.msra.gmra.mrb[0].mxu0 %v4815_v3 }
  0x97   : > { %1241 = vmatpush1.bf16.msra.mxu1 %v3465_v8  ;;  %1169 = vmatprep.mubr.bf16.mxu1 %v4820_v6  ;;  %v4926_v8 = vld [vmem:[%s5716_s0 + $0x74] ss:$8 sps:$4 sm:$0xff]  }
  0x98   : > { %1242 = vmatprep.subr.bf16.mxu1 %v3474_v11  ;;  %1395 = vmatprep.mubr.bf16.mxu0 %v4820_v6  ;;  %v396_v11 = vld [vmem:[%s4725_s27 + $0x3a8] sm:$0xff] }
  0x9b   : > { %1243 = vmatpush1.bf16.msra.mxu1 %v3473_v13  ;;  %v3578_v13 = vcombine.high %v392_v10, %v396_v11 }
  0x9c   : > { %1244 = vmatprep.subr.bf16.mxu1 %v3482_v17  ;;  %v4939_v17 = vld [vmem:[%s5716_s0 + $0x70] ss:$8 sps:$4 sm:$0xff]  }
  0x9e   : > { %1170 = vmatmul.mubr.bf16.gmra.mrb[4].mxu1 %v4831_v16  ;;  %1396 = vmatmul.mubr.bf16.gmra.mrb[4].mxu0 %v4831_v16 }
  0x9f   : > { %1245 = vmatpush1.bf16.msra.mxu1 %v3481_v19  ;;  %1179 = vmatprep.mubr.bf16.mxu1 %v4836_v18  ;;  %v3577_v19 = vcombine.low %v392_v10, %v396_v11  ;;  %v338_v10 = vld [vmem:[%s4725_s27 + $0x1d8] sm:$0xff] }
  0xa0   : > { %1246 = vmatprep.subr.bf16.mxu1 %v3490_v21  ;;  %1405 = vmatprep.mubr.bf16.mxu0 %v4836_v18  ;;  %v282_v21 = vld [vmem:[%s4725_s27 + $0x18] sm:$0xff] }
  0xa1   : > { %v342_v11 = vld [vmem:[%s4725_s27 + $0x1f8] sm:$0xff] }
  0xa2   : > { %v3526_v14 = vcombine.high %v338_v10, %v342_v11 }
  0xa3   : > { %1247 = vmatpush1.bf16.msra.mxu1 %v3489_v23  ;;  %v4051_v23 = vld [vmem:[%s4731_s25] ss:$8 sps:$4 sm:$0xff]  }
  0xa4   : > { %1248 = vmatprep.subr.bf16.mxu1 %v3498_v24  ;;  %v4053_v24 = vld [vmem:[%s4731_s25 + $0x4] ss:$8 sps:$4 sm:$0xff]  }
  0xa5   : > { %2891 = vmatprep.subr.bf16.mxu0 %v4053_v24  ;;  %v4077_v24 = vld [vmem:[%s4731_s25 + $0x84] ss:$8 sps:$4 sm:$0xff]  }
  0xa6   : > { %1180 = vmatmul.mubr.bf16.gmra.mrb[8].mxu1 %v4849_v27  ;;  %1406 = vmatmul.mubr.bf16.gmra.mrb[8].mxu0 %v4849_v27 }
  0xa7   : > { %1249 = vmatpush1.bf16.msra.mxu1 %v3497_v28  ;;  %1189 = vmatprep.mubr.bf16.mxu1 %v4854_v29  ;;  %v3470_v28 = vcombine.high %v282_v21, %v286_v22 }
  0xa8   : > { %1250 = vmatprep.subr.bf16.mxu1 %v3506_v30  ;;  %1415 = vmatprep.mubr.bf16.mxu0 %v4854_v29  ;;  %v290_v30 = vld [vmem:[%s4725_s27 + $0x58] sm:$0xff] }
  0xa9   : > { %2892 = vmatpush1.bf16.msra.mxu0 %v4051_v23  ;;  %v3477_v42 = vcombine.low %v290_v30, %v294_v31 }
  0xaa   : > { %2893 = vmatprep.subr.bf16.mxu0 %v4056_v26  ;;  %v358_v26 = vld [vmem:[%s4725_s27 + $0x278] sm:$0xff] }
  0xab   : > { %1251 = vmatpush1.bf16.msra.mxu1 %v3505_v33  ;;  %v4059_v33 = vld [vmem:[%s4731_s25 + $0x24] ss:$8 sps:$4 sm:$0xff]  }
  0xac   : > { %1252 = vmatprep.subr.bf16.mxu1 %v3514_v34  ;;  %v3469_v34 = vcombine.low %v282_v21, %v286_v22  ;;  %v4072_v21 = vld [vmem:[%s4731_s25 + $0x70] ss:$8 sps:$4 sm:$0xff]   ;;  %v3525_v22 = vcombine.low %v338_v10, %v342_v11  ;;  %v4095_v10 = vld [vmem:[%s4731_s25 + $0xe4] ss:$8 sps:$4 sm:$0xff]  }
  0xad   : > { %2894 = vmatpush1.bf16.msra.mxu0 %v4054_v32  ;;  %v4080_v32 = vld [vmem:[%s4731_s25 + $0x94] ss:$8 sps:$4 sm:$0xff]  }
  0xae   : > { %1190 = vmatmul.mubr.bf16.gmra.mrb[12].mxu1 %v4867_v37  ;;  %1416 = vmatmul.mubr.bf16.gmra.mrb[12].mxu0 %v4867_v37 }
  0xaf   : > { %1253 = vmatpush1.bf16.msra.mxu1 %v3513_v38  ;;  %1199 = vmatprep.mubr.bf16.mxu1 %v4872_v39  ;;  %v4057_v38 = vld [vmem:[%s4731_s25 + $0x20] ss:$8 sps:$4 sm:$0xff]  }
  0xb0   : > { %1254 = vmatprep.subr.bf16.mxu1 %v3522_v40  ;;  %1425 = vmatprep.mubr.bf16.mxu0 %v4872_v39  ;;  %v4062_v40 = vld [vmem:[%s4731_s25 + $0x34] ss:$8 sps:$4 sm:$0xff]  }
  0xb1   : > { %2895 = vmatprep.subr.bf16.mxu0 %v4059_v33  ;;  %v362_v33 = vld [vmem:[%s4725_s27 + $0x298] sm:$0xff] }
  0xb2   : > { %2896 = vmatpush1.bf16.msra.mxu0 %v4057_v38  ;;  %v370_v38 = vld [vmem:[%s4725_s27 + $0x2d8] sm:$0xff] }
  0xb3   : > { %1255 = vmatpush1.bf16.msra.mxu1 %v3521_v44  ;;  %v306_v44 = vld [vmem:[%s4725_s27 + $0xd8] sm:$0xff]  ;;  %2897 = vmatprep.subr.bf16.mxu0 %v4062_v40 }
  0xb4   : > { %1256 = vmatprep.subr.bf16.mxu1 %v3530_v45  ;;  %v310_v45 = vld [vmem:[%s4725_s27 + $0xf8] sm:$0xff] }
  0xb5   : > { %v3493_v56 = vcombine.low %v306_v44, %v310_v45  ;;  %v374_v40 = vld [vmem:[%s4725_s27 + $0x2f8] sm:$0xff] }
  0xb6   : > { %1200 = vmatmul.mubr.bf16.gmra.mrb[16].mxu1 %v4885_v48  ;;  %1426 = vmatmul.mubr.bf16.gmra.mrb[16].mxu0 %v4885_v48  ;;  %v3557_v52 = vcombine.low %v370_v38, %v374_v40 }
  0xb7   : > { %1257 = vmatpush1.bf16.msra.mxu1 %v3529_v49  ;;  %1209 = vmatprep.mubr.bf16.mxu1 %v4890_v50  ;;  %v3485_v49 = vcombine.low %v298_v35, %v302_v36 }
  0xb8   : > { %1258 = vmatprep.subr.bf16.mxu1 %v3538_v51  ;;  %1435 = vmatprep.mubr.bf16.mxu0 %v4890_v50  ;;  %v3494_v51 = vcombine.high %v306_v44, %v310_v45  ;;  %v3558_v45 = vcombine.high %v370_v38, %v374_v40 }
  0xb9   : > { %2898 = vmatpush1.bf16.msra.mxu0 %v4060_v46  ;;  %v378_v46 = vld [vmem:[%s4725_s27 + $0x318] sm:$0xff] }
  0xba   : > { %2899 = vmatprep.subr.bf16.mxu0 %v4065_v47  ;;  %v382_v47 = vld [vmem:[%s4725_s27 + $0x338] sm:$0xff] }
  0xbb   : > { %1259 = vmatpush1.bf16.msra.mxu1 %v3537_v54  ;;  %v4063_v54 = vld [vmem:[%s4731_s25 + $0x40] ss:$8 sps:$4 sm:$0xff]   ;;  %v3566_v53 = vcombine.high %v378_v46, %v382_v47 }
  0xbc   : > { %1260 = vmatprep.subr.bf16.mxu1 %v3546_v55  ;;  %v4068_v55 = vld [vmem:[%s4731_s25 + $0x54] ss:$8 sps:$4 sm:$0xff]  }
  0xbd   : > { %2900 = vmatpush1.bf16.msra.mxu0 %v4063_v54  ;;  %v386_v54 = vld [vmem:[%s4725_s27 + $0x358] sm:$0xff] }
  0xbe   : > { %1210 = vmatmul.mubr.bf16.gmra.mrb[20].mxu1 %v4903_v58  ;;  %1436 = vmatmul.mubr.bf16.gmra.mrb[20].mxu0 %v4903_v58 }
  0xbf   : > { %1261 = vmatpush1.bf16.msra.mxu1 %v3545_v59  ;;  %1219 = vmatprep.mubr.bf16.mxu1 %v4908_v60  ;;  %v322_v59 = vld [vmem:[%s4725_s27 + $0x158] sm:$0xff] }
  0xc0   : > { %1262 = vmatprep.subr.bf16.mxu1 %v3554_v61  ;;  %1445 = vmatprep.mubr.bf16.mxu0 %v4908_v60  ;;  %v326_v61 = vld [vmem:[%s4725_s27 + $0x178] sm:$0xff] }
  0xc1   : > { %2901 = vmatprep.subr.bf16.mxu0 %v4068_v55  ;;  %v3509_v4 = vcombine.low %v322_v59, %v326_v61  ;;  %v390_v55 = vld [vmem:[%s4725_s27 + $0x378] sm:$0xff] }
  0xc2   : > { %2902 = vmatpush1.bf16.msra.mxu0 %v4066_v62  ;;  %v394_v62 = vld [vmem:[%s4725_s27 + $0x398] sm:$0xff] }
  0xc3   : > { %1263 = vmatpush1.bf16.msra.mxu1 %v3553_v0  ;;  %v3510_v0 = vcombine.high %v322_v59, %v326_v61  ;;  %v3565_v59 = vcombine.low %v378_v46, %v382_v47  ;;  %v3574_v61 = vcombine.high %v386_v54, %v390_v55 }
  0xc4   : > { %1264 = vmatprep.subr.bf16.mxu1 %v3562_v1  ;;  %v330_v1 = vld [vmem:[%s4725_s27 + $0x198] sm:$0xff] }
  0xc6   : > { %1220 = vmatmul.mubr.bf16.gmra.mrb[24].mxu1 %v4921_v5  ;;  %1446 = vmatmul.mubr.bf16.gmra.mrb[24].mxu0 %v4921_v5 }
  0xc7   : > { %1265 = vmatpush1.bf16.msra.mxu1 %v3561_v7  ;;  %1229 = vmatprep.mubr.bf16.mxu1 %v4926_v8  ;;  %v3518_v7 = vcombine.high %v330_v1, %v334_v2 }
  0xc8   : > { %1266 = vmatprep.subr.bf16.mxu1 %v3570_v9  ;;  %1455 = vmatprep.mubr.bf16.mxu0 %v4926_v8  ;;  %v4071_v9 = vld [vmem:[%s4731_s25 + $0x64] ss:$8 sps:$4 sm:$0xff]  }
  0xc9   : > { %2903 = vmatprep.subr.bf16.mxu0 %v4071_v9  ;;  %v406_v9 = vld [vmem:[%s4725_s27 + $0x3f8] sm:$0xff] }
  0xcb   : > { %1267 = vmatpush1.bf16.msra.mxu1 %v3569_v12  ;;  %v4069_v12 = vld [vmem:[%s4731_s25 + $0x60] ss:$8 sps:$4 sm:$0xff]  }
  0xcc   : > { %1268 = vmatprep.subr.bf16.mxu1 %v3578_v13  ;;  %v3517_v13 = vcombine.low %v330_v1, %v334_v2  ;;  %2904 = vmatpush1.bf16.msra.mxu0 %v4069_v12  ;;  %v4090_v1 = vld [vmem:[%s4731_s25 + $0xd0] ss:$8 sps:$4 sm:$0xff]   ;;  %v3573_v2 = vcombine.low %v386_v54, %v390_v55  ;;  %v4093_v12 = vld [vmem:[%s4731_s25 + $0xe0] ss:$8 sps:$4 sm:$0xff]  }
  0xcd   : > { %2905 = vmatprep.subr.bf16.mxu0 %v4074_v15  ;;  %v4403_v15 = vld [vmem:[%s5716_s0 + $0x4] ss:$8 sps:$4 sm:$0xff]  }
  0xce   : > { %1230 = vmatmul.mubr.bf16.gmra.mrb[28].mxu1 %v4939_v17  ;;  %1456 = vmatmul.mubr.bf16.gmra.mrb[28].mxu0 %v4939_v17 }
  0xcf   : > { %1269 = vmatpush1.bf16.msra.mxu1 %v3577_v19  ;;  %1272 = vmatprep.mubr.bf16.mxu1 %v4762_v41  ;;  %v3478_v41 = vcombine.high %v290_v30, %v294_v31  ;;  %v346_v19 = vld [vmem:[%s4725_s27 + $0x218] sm:$0xff] }
  0xd0   : > { %1270 = vmatprep.subr.bf16.mxu1 %v3586_v20  ;;  %v350_v20 = vld [vmem:[%s4725_s27 + $0x238] sm:$0xff]  ;;  %2906 = vmatpush1.bf16.msra.mxu0 %v4072_v21 }
  0xd1   : > { %v3534_v23 = vcombine.high %v346_v19, %v350_v20  ;;  %2907 = vmatprep.subr.bf16.mxu0 %v4077_v24  ;;  %v3533_v30 = vcombine.low %v346_v19, %v350_v20  ;;  %v4098_v19 = vld [vmem:[%s4731_s25 + $0xf4] ss:$8 sps:$4 sm:$0xff]   ;;  %v4096_v20 = vld [vmem:[%s4731_s25 + $0xf0] ss:$8 sps:$4 sm:$0xff]  }
  0xd3   : > { %1271 = vmatpush1.bf16.msra.mxu1 %v3585_v25  ;;  %v354_v25 = vld [vmem:[%s4725_s27 + $0x258] sm:$0xff] }
  0xd4   : > { %1466 = vmatprep.subr.bf16.mxu1 %v3470_v28  ;;  %v4075_v28 = vld [vmem:[%s4731_s25 + $0x80] ss:$8 sps:$4 sm:$0xff]   ;;  %v3542_v31 = vcombine.high %v354_v25, %v358_v26  ;;  %v3541_v35 = vcombine.low %v354_v25, %v358_v26 }
  0xd5   : > { %2908 = vmatpush1.bf16.msra.mxu0 %v4075_v28 }
  0xd6   : > { %1273 = vmatmul.mubr.bf16.vlgmr.msra.gmra.mrb[32].mxu1 %v4815_v3  ;;  %2909 = vmatprep.subr.bf16.mxu0 %v4080_v32 }
  0xd7   : > { %1467 = vmatpush1.bf16.msra.mxu1 %v3469_v34  ;;  %1282 = vmatprep.mubr.bf16.mxu1 %v4820_v6  ;;  %v366_v34 = vld [vmem:[%s4725_s27 + $0x2b8] sm:$0xff] }
  0xd8   : > { %1468 = vmatprep.subr.bf16.mxu1 %v3478_v41  ;;  %v4078_v41 = vld [vmem:[%s4731_s25 + $0x90] ss:$8 sps:$4 sm:$0xff]   ;;  %v3550_v36 = vcombine.high %v362_v33, %v366_v34  ;;  %v3549_v44 = vcombine.low %v362_v33, %v366_v34 }
  0xd9   : > { %2910 = vmatpush1.bf16.msra.mxu0 %v4078_v41 }
  0xdb   : > { %1469 = vmatpush1.bf16.msra.mxu1 %v3477_v42  ;;  %v4083_v42 = vld [vmem:[%s4731_s25 + $0xa4] ss:$8 sps:$4 sm:$0xff]  }
  0xdc   : > { %1470 = vmatprep.subr.bf16.mxu1 %v3486_v43  ;;  %v4081_v43 = vld [vmem:[%s4731_s25 + $0xa0] ss:$8 sps:$4 sm:$0xff]   ;;  %2911 = vmatprep.subr.bf16.mxu0 %v4083_v42 }
  0xdd   : > { %2912 = vmatpush1.bf16.msra.mxu0 %v4081_v43 }
  0xde   : > { %1283 = vmatmul.mubr.bf16.gmra.mrb[36].mxu1 %v4831_v16 }
  0xdf   : > { %1471 = vmatpush1.bf16.msra.mxu1 %v3485_v49  ;;  %1292 = vmatprep.mubr.bf16.mxu1 %v4836_v18  ;;  %v4086_v49 = vld [vmem:[%s4731_s25 + $0xb4] ss:$8 sps:$4 sm:$0xff]  }
  0xe0   : > { %1472 = vmatprep.subr.bf16.mxu1 %v3494_v51  ;;  %v4084_v51 = vld [vmem:[%s4731_s25 + $0xb0] ss:$8 sps:$4 sm:$0xff]   ;;  %2913 = vmatprep.subr.bf16.mxu0 %v4086_v49 }
  0xe1   : > { %2914 = vmatpush1.bf16.msra.mxu0 %v4084_v51 }
  0xe3   : > { %1473 = vmatpush1.bf16.msra.mxu1 %v3493_v56  ;;  %v4089_v56 = vld [vmem:[%s4731_s25 + $0xc4] ss:$8 sps:$4 sm:$0xff]  }
  0xe4   : > { %1474 = vmatprep.subr.bf16.mxu1 %v3502_v57  ;;  %v4087_v57 = vld [vmem:[%s4731_s25 + $0xc0] ss:$8 sps:$4 sm:$0xff]   ;;  %2915 = vmatprep.subr.bf16.mxu0 %v4089_v56 }
  0xe5   : > { %2916 = vmatpush1.bf16.msra.mxu0 %v4087_v57 }
  0xe6   : > { %1293 = vmatmul.mubr.bf16.gmra.mrb[40].mxu1 %v4849_v27 }
  0xe7   : > { %1475 = vmatpush1.bf16.msra.mxu1 %v3501_v63  ;;  %1302 = vmatprep.mubr.bf16.mxu1 %v4854_v29  ;;  %v398_v63 = vld [vmem:[%s4725_s27 + $0x3b8] sm:$0xff] }
  0xe8   : > { %1476 = vmatprep.subr.bf16.mxu1 %v3510_v0  ;;  %v4092_v0 = vld [vmem:[%s4731_s25 + $0xd4] ss:$8 sps:$4 sm:$0xff]   ;;  %v3581_v11 = vcombine.low %v394_v62, %v398_v63 }
  0xe9   : > { %2917 = vmatprep.subr.bf16.mxu0 %v4092_v0 }
  0xea   : > { %2918 = vmatpush1.bf16.msra.mxu0 %v4090_v1 }
  0xeb   : > { %1477 = vmatpush1.bf16.msra.mxu1 %v3509_v4  ;;  %v3582_v4 = vcombine.high %v394_v62, %v398_v63  ;;  %2919 = vmatprep.subr.bf16.mxu0 %v4095_v10 }
  0xec   : > { %1478 = vmatprep.subr.bf16.mxu1 %v3518_v7  ;;  %v402_v7 = vld [vmem:[%s4725_s27 + $0x3d8] sm:$0xff] }
  0xee   : > { %1303 = vmatmul.mubr.bf16.gmra.mrb[44].mxu1 %v4867_v37  ;;  %2920 = vmatpush1.bf16.msra.mxu0 %v4093_v12 }
  0xef   : > { %1479 = vmatpush1.bf16.msra.mxu1 %v3517_v13  ;;  %1312 = vmatprep.mubr.bf16.mxu1 %v4872_v39  ;;  %v3590_v13 = vcombine.high %v402_v7, %v406_v9 }
  0xf0   : > { %1480 = vmatprep.subr.bf16.mxu1 %v3526_v14  ;;  %v3589_v14 = vcombine.low %v402_v7, %v406_v9  ;;  %2921 = vmatprep.subr.bf16.mxu0 %v4098_v19 }
  0xf2   : > { %2922 = vmatpush1.bf16.msra.mxu0 %v4096_v20 }
  0xf3   : > { %1481 = vmatpush1.bf16.msra.mxu1 %v3525_v22 }
  0xf4   : > { %1482 = vmatprep.subr.bf16.mxu1 %v3534_v23 }
  0xf6   : > { %1313 = vmatmul.mubr.bf16.gmra.mrb[48].mxu1 %v4885_v48 }
  0xf7   : > { %1483 = vmatpush1.bf16.msra.mxu1 %v3533_v30  ;;  %1322 = vmatprep.mubr.bf16.mxu1 %v4890_v50 }
  0xf8   : > { %1484 = vmatprep.subr.bf16.mxu1 %v3542_v31 }
  0xfb   : > { %1485 = vmatpush1.bf16.msra.mxu1 %v3541_v35 }
  0xfc   : > { %1486 = vmatprep.subr.bf16.mxu1 %v3550_v36 }
  0xfe   : > { %1323 = vmatmul.mubr.bf16.gmra.mrb[52].mxu1 %v4903_v58 }
  0xff   : > { %1487 = vmatpush1.bf16.msra.mxu1 %v3549_v44  ;;  %1332 = vmatprep.mubr.bf16.mxu1 %v4908_v60 }
 0x100   : > { %1488 = vmatprep.subr.bf16.mxu1 %v3558_v45 }
 0x103   : > { %1489 = vmatpush1.bf16.msra.mxu1 %v3557_v52 }
 0x104   : > { %1490 = vmatprep.subr.bf16.mxu1 %v3566_v53 }
 0x106   : > { %1333 = vmatmul.mubr.bf16.gmra.mrb[56].mxu1 %v4921_v5 }
 0x107   : > { %1491 = vmatpush1.bf16.msra.mxu1 %v3565_v59  ;;  %1342 = vmatprep.mubr.bf16.mxu1 %v4926_v8 }
 0x108   : > { %1492 = vmatprep.subr.bf16.mxu1 %v3574_v61 }
 0x10b   : > { %1493 = vmatpush1.bf16.msra.mxu1 %v3573_v2 }
 0x10c   : > { %1494 = vmatprep.subr.bf16.mxu1 %v3582_v4 }
 0x10e   : > { %1343 = vmatmul.mubr.bf16.gmra.mrb[60].mxu1 %v4939_v17 }
 0x10f   : > { %1495 = vmatpush1.bf16.msra.mxu1 %v3581_v11  ;;  %1498 = vmatprep.mubr.bf16.mxu1 %v4403_v15 }
 0x110   : > { %1496 = vmatprep.subr.bf16.mxu1 %v3590_v13 }
 0x113   : > { %1497 = vmatpush1.bf16.msra.mxu1 %v3589_v14 }
 0x116   : > { %1499 = vmatmul.mubr.bf16.vlgmr.msra.gmra.mrb[64].mxu1 %v4815_v3  ;;  %v4101_v3 = vld [vmem:[%s4731_s25 + $0x104] ss:$8 sps:$4 sm:$0xff]  }
 0x117   : > { %1508 = vmatprep.mubr.bf16.mxu1 %v4820_v6  ;;  %3004 = vmatprep.subr.bf16.mxu0 %v4101_v3 }
 0x11e   : > { %1509 = vmatmul.mubr.bf16.gmra.mrb[68].mxu1 %v4831_v16 }
 0x11f   : > { %1518 = vmatprep.mubr.bf16.mxu1 %v4836_v18 }
 0x126   : > { %1519 = vmatmul.mubr.bf16.gmra.mrb[72].mxu1 %v4849_v27 }
 0x127   : > { %1528 = vmatprep.mubr.bf16.mxu1 %v4854_v29 }
 0x12e   : > { %1529 = vmatmul.mubr.bf16.gmra.mrb[76].mxu1 %v4867_v37 }
 0x12f   : > { %1538 = vmatprep.mubr.bf16.mxu1 %v4872_v39 }
 0x136   : > { %1539 = vmatmul.mubr.bf16.gmra.mrb[80].mxu1 %v4885_v48 }
 0x137   : > { %1548 = vmatprep.mubr.bf16.mxu1 %v4890_v50 }
 0x13e   : > { %1549 = vmatmul.mubr.bf16.gmra.mrb[84].mxu1 %v4903_v58 }
 0x13f   : > { %1558 = vmatprep.mubr.bf16.mxu1 %v4908_v60 }
 0x146   : > { %1559 = vmatmul.mubr.bf16.gmra.mrb[88].mxu1 %v4921_v5 }
 0x147   : > { %1568 = vmatprep.mubr.bf16.mxu1 %v4926_v8 }
 0x14e   : > { %1569 = vmatmul.mubr.bf16.gmra.mrb[92].mxu1 %v4939_v17 }
 0x169   : > { %v5044_v6 = vpop.f32.mrb[0].mxu1  ;;  %v5056_v50 = vpop.f32.mrb[0].mxu0 }
 0x16a   : > { %v3591_v16 = vmul.f32 -1.442695, %v5044_v6  ;;  %v5047_v18 = vpop.f32.mrb[1].mxu1  ;;  %v5058_v58 = vpop.f32.mrb[1].mxu0  ;;  %v3719_v62 = vclamps-f32 %v5056_v50, 10.0 }
 0x16b   : > { %v3592_v27 = vmul.f32 -1.442695, %v5047_v18  ;;  %v5050_v29 = vpop.f32.mrb[2].mxu1  ;;  %v5060_v60 = vpop.f32.mrb[2].mxu0  ;;  %v3720_v63 = vclamps-f32 %v5058_v58, 10.0 }
 0x16c   : > { %4147 = vpow2.f32 %v3591_v16  ;;  %v3595_v37 = vmul.f32 -1.442695, %v5050_v29  ;;  %v5053_v39 = vpop.f32.mrb[3].mxu1  ;;  %v5064_v8 = vpop.f32.mrb[3].mxu0  ;;  %v3723_v7 = vclamps-f32 %v5060_v60, 10.0 }
 0x16d   : > { %4149 = vpow2.f32 %v3592_v27  ;;  %v3596_v48 = vmul.f32 -1.442695, %v5053_v39  ;;  %v3724_v9 = vclamps-f32 %v5064_v8, 10.0 }
 0x16e   : > { %4151 = vpow2.f32 %v3595_v37 }
 0x16f   : > { %4153 = vpow2.f32 %v3596_v48 }
 0x171   : > { %v5062_v5 = vpop.f32.mrb[4].mxu1  ;;  %v5076_v30 = vpop.f32.mrb[4].mxu0 }
 0x172   : > { %v3599_v17 = vmul.f32 -1.442695, %v5062_v5  ;;  %v5067_v21 = vpop.f32.mrb[5].mxu1  ;;  %v5078_v33 = vpop.f32.mrb[5].mxu0  ;;  %v3727_v14 = vclamps-f32 %v5076_v30, 10.0 }
 0x173   : > { %v3600_v22 = vmul.f32 -1.442695, %v5067_v21  ;;  %v5070_v23 = vpop.f32.mrb[6].mxu1  ;;  %v5080_v35 = vpop.f32.mrb[6].mxu0  ;;  %v3728_v3 = vclamps-f32 %v5078_v33, 10.0 }
 0x174   : > { %4155 = vpow2.f32 %v3599_v17  ;;  %v3603_v24 = vmul.f32 -1.442695, %v5070_v23  ;;  %v5073_v25 = vpop.f32.mrb[7].mxu1  ;;  %v5084_v42 = vpop.f32.mrb[7].mxu0  ;;  %v3731_v16 = vclamps-f32 %v5080_v35, 10.0 }
 0x175   : > { %4157 = vpow2.f32 %v3600_v22  ;;  %v3604_v26 = vmul.f32 -1.442695, %v5073_v25  ;;  %v3732_v58 = vclamps-f32 %v5084_v42, 10.0  ;;  %v4099_v35 = vld [vmem:[%s4731_s25 + $0x100] ss:$8 sps:$4 sm:$0xff]  }
 0x176   : > { %v4148_v28 = vpop.eup %4147  ;;  %4159 = vpow2.f32 %v3603_v24  ;;  %v4104_v42 = vld [vmem:[%s4731_s25 + $0x114] ss:$8 sps:$4 sm:$0xff]  }
 0x177   : > { %v4150_v31 = vpop.eup %4149  ;;  %v1771_v32 = vadd.f32 1.0, %v4148_v28  ;;  %4161 = vpow2.f32 %v3604_v26 }
 0x178   : > { %v4152_v34 = vpop.eup %4151  ;;  %v1772_v41 = vadd.f32 1.0, %v4150_v31 }
 0x179   : > { %v4154_v36 = vpop.eup %4153  ;;  %4163 = vrcp.f32 %v1771_v32  ;;  %v1775_v38 = vadd.f32 1.0, %v4152_v34  ;;  %v5082_v40 = vpop.f32.mrb[8].mxu1 }
 0x17a   : > { %4165 = vrcp.f32 %v1772_v41  ;;  %v1776_v43 = vadd.f32 1.0, %v4154_v36  ;;  %v3607_v44 = vmul.f32 -1.442695, %v5082_v40  ;;  %v5087_v45 = vpop.f32.mrb[9].mxu1  ;;  %v5096_v54 = vpop.f32.mrb[8].mxu0 }
 0x17b   : > { %4167 = vrcp.f32 %v1775_v38  ;;  %v3608_v46 = vmul.f32 -1.442695, %v5087_v45  ;;  %v5090_v47 = vpop.f32.mrb[10].mxu1  ;;  %v5098_v57 = vpop.f32.mrb[9].mxu0  ;;  %v3735_v22 = vclamps-f32 %v5096_v54, 10.0 }
 0x17c   : > { %4169 = vrcp.f32 %v1776_v43  ;;  %v3611_v49 = vmul.f32 -1.442695, %v5090_v47  ;;  %v5093_v51 = vpop.f32.mrb[11].mxu1  ;;  %v5102_v0 = vpop.f32.mrb[10].mxu0 }
 0x17d   : > { %4171 = vpow2.f32 %v3607_v44  ;;  %v3612_v52 = vmul.f32 -1.442695, %v5093_v51  ;;  %v5108_v10 = vpop.f32.mrb[11].mxu0 }
 0x17e   : > { %v4156_v53 = vpop.eup %4155  ;;  %4173 = vpow2.f32 %v3608_v46 }
 0x17f   : > { %v4158_v55 = vpop.eup %4157  ;;  %v1779_v56 = vadd.f32 1.0, %v4156_v53  ;;  %4175 = vpow2.f32 %v3611_v49 }
 0x180   : > { %v4160_v59 = vpop.eup %4159  ;;  %v1780_v61 = vadd.f32 1.0, %v4158_v55  ;;  %4177 = vpow2.f32 %v3612_v52 }
 0x181   : > { %v4162_v1 = vpop.eup %4161  ;;  %4179 = vrcp.f32 %v1779_v56  ;;  %v1783_v2 = vadd.f32 1.0, %v4160_v59  ;;  %v5104_v4 = vpop.f32.mrb[12].mxu1 }
 0x182   : > { %4181 = vrcp.f32 %v1780_v61  ;;  %v1784_v11 = vadd.f32 1.0, %v4162_v1  ;;  %v3615_v12 = vmul.f32 -1.442695, %v5104_v4  ;;  %v5111_v13 = vpop.f32.mrb[13].mxu1  ;;  %v5129_v31 = vpop.f32.mrb[12].mxu0 }
 0x183   : > { %v4164_v15 = vpop.eup %4163  ;;  %4183 = vrcp.f32 %v1783_v2  ;;  %v3616_v19 = vmul.f32 -1.442695, %v5111_v13  ;;  %v5115_v20 = vpop.f32.mrb[14].mxu1 }
 0x184   : > { %v4166_v27 = vpop.eup %4165  ;;  %v1963_v37 = vmul.f32 %v4164_v15, %v5044_v6  ;;  %4185 = vrcp.f32 %v1784_v11  ;;  %v3619_v48 = vmul.f32 -1.442695, %v5115_v20  ;;  %v5121_v50 = vpop.f32.mrb[15].mxu1  ;;  %v3736_v6 = vclamps-f32 %v5098_v57, 10.0 }
 0x185   : > { %v4168_v60 = vpop.eup %4167  ;;  %v1964_v8 = vmul.f32 %v4166_v27, %v5047_v18  ;;  %4187 = vpow2.f32 %v3615_v12  ;;  %v3620_v17 = vmul.f32 -1.442695, %v5121_v50  ;;  %v3739_v18 = vclamps-f32 %v5102_v0, 10.0  ;;  %v5133_v36 = vpop.f32.mrb[13].mxu0  ;;  %v4105_v0 = vld [vmem:[%s4731_s25 + $0x120] ss:$8 sps:$4 sm:$0xff]  }
 0x186   : > { %v4170_v24 = vpop.eup %4169  ;;  %v3655_v26 = vclamps-f32 %v1963_v37, 10.0  ;;  %v1967_v28 = vmul.f32 %v4168_v60, %v5050_v29  ;;  %4189 = vpow2.f32 %v3616_v19  ;;  %v5135_v29 = vpop.f32.mrb[14].mxu0 }
 0x187   : > { %v4172_v32 = vpop.eup %4171  ;;  %v3656_v34 = vclamps-f32 %v1964_v8, 10.0  ;;  %v1968_v41 = vmul.f32 %v4170_v24, %v5053_v39  ;;  %4191 = vpow2.f32 %v3619_v48  ;;  %v3740_v39 = vclamps-f32 %v5108_v10, 10.0  ;;  %v5142_v59 = vpop.f32.mrb[15].mxu0 }
 0x188   : > { %v4174_v38 = vpop.eup %4173  ;;  %v3659_v43 = vclamps-f32 %v1967_v28, 10.0  ;;  %v1787_v44 = vadd.f32 1.0, %v4172_v32  ;;  %4193 = vpow2.f32 %v3620_v17  ;;  %v2283_v46 = vmul.f32 %v3719_v62, %v3655_v26 }
 0x189   : > { %v4176_v49 = vpop.eup %4175  ;;  %v3660_v52 = vclamps-f32 %v1968_v41, 10.0  ;;  %v1788_v53 = vadd.f32 1.0, %v4174_v38  ;;  %v5137_v55 = vmul.f32 %v3720_v63, %v3656_v34  ;;  %v5139_v56 = vpop.f32.mrb[16].mxu1 }
 0x18a   : > { %v4178_v61 = vpop.eup %4177  ;;  %4195 = vrcp.f32 %v1787_v44  ;;  %v1791_v1 = vadd.f32 1.0, %v4176_v49  ;;  %v3783_v2 = vclamps-f32 %v2283_v46, 10.0  ;;  %v2287_v11 = vmul.f32 %v3723_v7, %v3659_v43  ;;  %v5144_v12 = vpop.f32.mrb[17].mxu1 }
 0x18b   : > { %v4180_v62 = vpop.eup %4179  ;;  %4197 = vrcp.f32 %v1788_v53  ;;  %v1792_v15 = vadd.f32 1.0, %v4178_v61  ;;  %v3784_v19 = vclamps-f32 %v5137_v55, 10.0  ;;  %v2288_v63 = vmul.f32 %v3724_v9, %v3660_v52  ;;  %v5147_v27 = vpop.f32.mrb[18].mxu1 }
 0x18c   : > { %v4182_v37 = vpop.eup %4181  ;;  %v1971_v48 = vmul.f32 %v4180_v62, %v5062_v5  ;;  %4199 = vrcp.f32 %v1791_v1  ;;  %v3787_v60 = vclamps-f32 %v2287_v11, 10.0  ;;  %v3623_v8 = vmul.f32 -1.442695, %v5139_v56  ;;  %v5151_v17 = vpop.f32.mrb[19].mxu1 }
 0x18d   : > { %v4184_v7 = vpop.eup %4183  ;;  %v1972_v24 = vmul.f32 %v4182_v37, %v5067_v21  ;;  %4201 = vrcp.f32 %v1792_v15  ;;  %v3788_v26 = vclamps-f32 %v2288_v63, 10.0  ;;  %v3624_v28 = vmul.f32 -1.442695, %v5144_v12  ;;  %v5156_v5 = vpop.f32.mrb[16].mxu0 }
 0x18e   : > { %v4186_v32 = vpop.eup %4185  ;;  %v3663_v9 = vclamps-f32 %v1971_v48, 10.0  ;;  %v1975_v34 = vmul.f32 %v4184_v7, %v5070_v23  ;;  %v2475_v41 = vpack.c.bf16 %v3787_v60, %v3783_v2  ;;  %4203 = vpow2.f32 %v3623_v8  ;;  %v5160_v21 = vpop.f32.mrb[17].mxu0 }
 0x18f   : > { %v4188_v38 = vpop.eup %4187  ;;  %v3664_v43 = vclamps-f32 %v1972_v24, 10.0  ;;  %v1976_v44 = vmul.f32 %v4186_v32, %v5073_v25  ;;  %4205 = vpow2.f32 %v3624_v28  ;;  %v3627_v46 = vmul.f32 -1.442695, %v5147_v27  ;;  %v5165_v61 = vpop.f32.mrb[18].mxu0 }
 0x190   : > { %v4190_v49 = vpop.eup %4189  ;;  %v3667_v52 = vclamps-f32 %v1975_v34, 10.0  ;;  %v1795_v53 = vadd.f32 1.0, %v4188_v38  ;;  %v3628_v55 = vmul.f32 -1.442695, %v5151_v17  ;;  %v2291_v23 = vmul.f32 %v3727_v14, %v3663_v9  ;;  %v5171_v15 = vpop.f32.mrb[19].mxu0 }
 0x191   : > { %v4192_v1 = vpop.eup %4191  ;;  %v3668_v2 = vclamps-f32 %v1976_v44, 10.0  ;;  %v1796_v11 = vadd.f32 1.0, %v4190_v49  ;;  %4207 = vpow2.f32 %v3627_v46  ;;  %v2292_v25 = vmul.f32 %v3728_v3, %v3664_v43  ;;  %v5169_v62 = vpop.f32.mrb[20].mxu1 }
 0x192   : > { %v4194_v63 = vpop.eup %4193  ;;  %4209 = vrcp.f32 %v1795_v53  ;;  %v1799_v37 = vadd.f32 1.0, %v4192_v1  ;;  %v3791_v48 = vclamps-f32 %v2291_v23, 10.0  ;;  %v2295_v30 = vmul.f32 %v3731_v16, %v3667_v52  ;;  %v5175_v14 = vpop.f32.mrb[21].mxu1 }
 0x193   : > { %4211 = vrcp.f32 %v1796_v11  ;;  %v1800_v60 = vadd.f32 1.0, %v4194_v63  ;;  %v3792_v8 = vclamps-f32 %v2292_v25, 10.0  ;;  %v2296_v33 = vmul.f32 %v3732_v58, %v3668_v2  ;;  %v5179_v3 = vpop.f32.mrb[22].mxu1  ;;  %v4102_v25 = vld [vmem:[%s4731_s25 + $0x110] ss:$8 sps:$4 sm:$0xff]  }
 0x194   : > { %v4196_v7 = vpop.eup %4195  ;;  %4213 = vrcp.f32 %v1799_v37  ;;  %v3795_v24 = vclamps-f32 %v2295_v30, 10.0  ;;  %v3631_v28 = vmul.f32 -1.442695, %v5169_v62  ;;  %v2476_v32 = vpack.c.bf16 %v3788_v26, %v3784_v19  ;;  %v5182_v9 = vpop.f32.mrb[23].mxu1 }
 0x195   : > { %v4198_v16 = vpop.eup %4197  ;;  %v1979_v34 = vmul.f32 %v4196_v7, %v5082_v40  ;;  %4215 = vrcp.f32 %v1800_v60  ;;  %v3796_v38 = vclamps-f32 %v2296_v33, 10.0  ;;  %v3632_v43 = vmul.f32 -1.442695, %v5175_v14  ;;  %v5191_v26 = vpop.f32.mrb[20].mxu0 }
 0x196   : > { %v4200_v58 = vpop.eup %4199  ;;  %v1980_v44 = vmul.f32 %v4198_v16, %v5087_v45  ;;  %4217 = vpow2.f32 %v3628_v55  ;;  %2923 = vmatprep.mubr.bf16.mxu0 %v2476_v32  ;;  %v3635_v46 = vmul.f32 -1.442695, %v5179_v3  ;;  %v3636_v19 = vmul.f32 -1.442695, %v5182_v9  ;;  %v5194_v23 = vpop.f32.mrb[21].mxu0 }
 0x197   : > { %v4202_v49 = vpop.eup %4201  ;;  %v3671_v52 = vclamps-f32 %v1979_v34, 10.0  ;;  %v1983_v40 = vmul.f32 %v4200_v58, %v5090_v47  ;;  %4219 = vpow2.f32 %v3631_v28  ;;  %2924 = vmatmul.mubr.bf16.vlgmr.msra.gmra.mrb[32].mxu0 %v2475_v41  ;;  %v2480_v53 = vpack.c.bf16 %v3796_v38, %v3792_v8  ;;  %v5197_v11 = vpop.f32.mrb[22].mxu0 }
 0x198   : > { %v4204_v1 = vpop.eup %4203  ;;  %v3672_v45 = vclamps-f32 %v1980_v44, 10.0  ;;  %v1984_v55 = vmul.f32 %v4202_v49, %v5093_v51  ;;  %4221 = vpow2.f32 %v3632_v43  ;;  %v2479_v2 = vpack.c.bf16 %v3795_v24, %v3791_v48  ;;  %3005 = vmatpush1.bf16.msra.mxu0 %v4099_v35  ;;  %v5206_v60 = vpop.f32.mrb[23].mxu0  ;;  %v4107_v51 = vld [vmem:[%s4731_s25 + $0x124] ss:$8 sps:$4 sm:$0xff]  }
 0x199   : > { %v4206_v63 = vpop.eup %4205  ;;  %v3675_v37 = vclamps-f32 %v1983_v40, 10.0  ;;  %v1803_v30 = vadd.f32 1.0, %v4204_v1  ;;  %4223 = vpow2.f32 %v3635_v46  ;;  %v5202_v47 = vmul.f32 %v3735_v22, %v3671_v52  ;;  %v5204_v41 = vpop.f32.mrb[24].mxu1  ;;  %2933 = vmatprep.mubr.bf16.mxu0 %v2480_v53  ;;  %3006 = vmatprep.subr.bf16.mxu0 %v4104_v42  ;;  %v4110_v42 = vld [vmem:[%s4731_s25 + $0x134] ss:$8 sps:$4 sm:$0xff]  }
 0x19a   : > { %v3676_v48 = vclamps-f32 %v1984_v55, 10.0  ;;  %v1804_v8 = vadd.f32 1.0, %v4206_v63  ;;  %4225 = vpow2.f32 %v3636_v19  ;;  %v5211_v33 = vmul.f32 %v3736_v6, %v3672_v45  ;;  %v5213_v7 = vpop.f32.mrb[25].mxu1  ;;  %v5237_v44 = vpop.f32.mrb[24].mxu0  ;;  %v4108_v45 = vld [vmem:[%s4731_s25 + $0x130] ss:$8 sps:$4 sm:$0xff]  }
 0x19b   : > { %v4208_v54 = vpop.eup %4207  ;;  %4227 = vrcp.f32 %v1803_v30  ;;  %v5217_v22 = vmul.f32 %v3739_v18, %v3675_v37  ;;  %v3639_v24 = vmul.f32 -1.442695, %v5204_v41  ;;  %v5220_v28 = vpop.f32.mrb[26].mxu1  ;;  %v3743_v16 = vclamps-f32 %v5129_v31, 10.0  ;;  %v4113_v30 = vld [vmem:[%s4731_s25 + $0x144] ss:$8 sps:$4 sm:$0xff]  }
 0x19c   : > { %v4210_v32 = vpop.eup %4209  ;;  %4229 = vrcp.f32 %v1804_v8  ;;  %v1807_v35 = vadd.f32 1.0, %v4208_v54  ;;  %v5224_v57 = vmul.f32 %v3740_v39, %v3676_v48  ;;  %v5226_v6 = vpop.f32.mrb[27].mxu1  ;;  %3007 = vmatpush1.bf16.msra.mxu0 %v4102_v25  ;;  %v3640_v38 = vmul.f32 -1.442695, %v5213_v7 }
 0x19d   : > { %v4212_v18 = vpop.eup %4211  ;;  %v1987_v34 = vmul.f32 %v4210_v32, %v5104_v4  ;;  %4231 = vpow2.f32 %v3639_v24  ;;  %v3744_v43 = vclamps-f32 %v5133_v36, 10.0  ;;  %3008 = vmatprep.subr.bf16.mxu0 %v4107_v51  ;;  %v3643_v31 = vmul.f32 -1.442695, %v5220_v28  ;;  %v5241_v49 = vpop.f32.mrb[25].mxu0 }
 0x19e   : > { %v4214_v58 = vpop.eup %4213  ;;  %v1988_v10 = vmul.f32 %v4212_v18, %v5111_v13  ;;  %4233 = vrcp.f32 %v1807_v35  ;;  %v3804_v39 = vclamps-f32 %v5224_v57, 10.0  ;;  %v3644_v36 = vmul.f32 -1.442695, %v5226_v6  ;;  %v5245_v1 = vpop.f32.mrb[26].mxu0 }
 0x19f   : > { %v4216_v46 = vpop.eup %4215  ;;  %v3679_v4 = vclamps-f32 %v1987_v34, 10.0  ;;  %v1991_v19 = vmul.f32 %v4214_v58, %v5115_v20  ;;  %4235 = vpow2.f32 %v3640_v38  ;;  %2934 = vmatmul.mubr.bf16.gmra.mrb[36].mxu0 %v2479_v2  ;;  %v3747_v53 = vclamps-f32 %v5135_v29, 10.0  ;;  %v5252_v37 = vpop.f32.mrb[27].mxu0 }
 0x1a0   : > { %v4218_v52 = vpop.eup %4217  ;;  %v3680_v13 = vclamps-f32 %v1988_v10, 10.0  ;;  %v1992_v40 = vmul.f32 %v4216_v46, %v5121_v50  ;;  %4237 = vpow2.f32 %v3643_v31  ;;  %3009 = vmatpush1.bf16.msra.mxu0 %v4105_v0  ;;  %v3748_v8 = vclamps-f32 %v5142_v59, 10.0  ;;  %v4116_v31 = vld [vmem:[%s4731_s25 + $0x154] ss:$8 sps:$4 sm:$0xff]  }
 0x1a1   : > { %v4220_v55 = vpop.eup %4219  ;;  %v3683_v20 = vclamps-f32 %v1991_v19, 10.0  ;;  %v1808_v25 = vadd.f32 1.0, %v4218_v52  ;;  %4239 = vpow2.f32 %v3644_v36  ;;  %v5248_v2 = vmul.f32 %v3743_v16, %v3679_v4  ;;  %v5250_v63 = vpop.f32.mrb[28].mxu1  ;;  %3010 = vmatprep.subr.bf16.mxu0 %v4110_v42  ;;  %v4114_v52 = vld [vmem:[%s4731_s25 + $0x150] ss:$8 sps:$4 sm:$0xff]  }
 0x1a2   : > { %v4222_v50 = vpop.eup %4221  ;;  %v3684_v51 = vclamps-f32 %v1992_v40, 10.0  ;;  %v1811_v48 = vadd.f32 1.0, %v4220_v55  ;;  %v5255_v29 = vmul.f32 %v3744_v43, %v3680_v13  ;;  %v5258_v54 = vpop.f32.mrb[29].mxu1  ;;  %v3803_v35 = vclamps-f32 %v5217_v22, 10.0  ;;  %v4111_v43 = vld [vmem:[%s4731_s25 + $0x140] ss:$8 sps:$4 sm:$0xff]  }
 0x1a3   : > { %v4224_v24 = vpop.eup %4223  ;;  %4241 = vrcp.f32 %v1808_v25  ;;  %v1812_v32 = vadd.f32 1.0, %v4222_v50  ;;  %v5261_v57 = vmul.f32 %v3747_v53, %v3683_v20  ;;  %v5263_v16 = vpop.f32.mrb[30].mxu1  ;;  %v3800_v34 = vclamps-f32 %v5211_v33, 10.0  ;;  %v4119_v55 = vld [vmem:[%s4731_s25 + $0x164] ss:$8 sps:$4 sm:$0xff]  }
 0x1a4   : > { %v4226_v0 = vpop.eup %4225  ;;  %4243 = vrcp.f32 %v1811_v48  ;;  %v1815_v18 = vadd.f32 1.0, %v4224_v24  ;;  %v5266_v38 = vmul.f32 %v3748_v8, %v3684_v51  ;;  %v5268_v59 = vpop.f32.mrb[31].mxu1  ;;  %3011 = vmatpush1.bf16.msra.mxu0 %v4108_v45  ;;  %v3799_v58 = vclamps-f32 %v5202_v47, 10.0 }
 0x1a5   : > { %v4228_v42 = vpop.eup %4227  ;;  %4245 = vrcp.f32 %v1812_v32  ;;  %v1816_v22 = vadd.f32 1.0, %v4226_v0  ;;  %v3647_v10 = vmul.f32 -1.442695, %v5250_v63  ;;  %3012 = vmatprep.subr.bf16.mxu0 %v4113_v30  ;;  %v2484_v19 = vpack.c.bf16 %v3804_v39, %v3800_v34  ;;  %v5276_v36 = vpop.f32.mrb[28].mxu0 }
 0x1a6   : > { %v4230_v46 = vpop.eup %4229  ;;  %v1995_v33 = vmul.f32 %v4228_v42, %v5139_v56  ;;  %4247 = vrcp.f32 %v1815_v18  ;;  %v3812_v4 = vclamps-f32 %v5266_v38, 10.0  ;;  %v3648_v47 = vmul.f32 -1.442695, %v5258_v54  ;;  %v5281_v45 = vpop.f32.mrb[29].mxu0 }
 0x1a7   : > { %v4232_v13 = vpop.eup %4231  ;;  %v1996_v40 = vmul.f32 %v4230_v46, %v5144_v12  ;;  %4249 = vrcp.f32 %v1816_v22  ;;  %v2483_v53 = vpack.c.bf16 %v3803_v35, %v3799_v58  ;;  %2943 = vmatprep.mubr.bf16.mxu0 %v2484_v19  ;;  %v3651_v39 = vmul.f32 -1.442695, %v5263_v16  ;;  %v5285_v30 = vpop.f32.mrb[30].mxu0 }
 0x1a8   : > { %v4234_v20 = vpop.eup %4233  ;;  %v3687_v25 = vclamps-f32 %v1995_v33, 10.0  ;;  %v1819_v56 = vadd.f32 1.0, %v4232_v13  ;;  %4251 = vpow2.f32 %v3647_v10  ;;  %3013 = vmatpush1.bf16.msra.mxu0 %v4111_v43  ;;  %v3652_v48 = vmul.f32 -1.442695, %v5268_v59  ;;  %v5291_v24 = vpop.f32.mrb[31].mxu0 }
 0x1a9   : > { %v4236_v50 = vpop.eup %4235  ;;  %v3688_v51 = vclamps-f32 %v1996_v40, 10.0  ;;  %v1999_v12 = vmul.f32 %v4234_v20, %v5147_v27  ;;  %4253 = vpow2.f32 %v3648_v47  ;;  %2944 = vmatmul.mubr.bf16.gmra.mrb[40].mxu0 %v2483_v53  ;;  %v5289_v8 = vpop.f32.mrb[32].mxu1  ;;  %3014 = vmatprep.subr.bf16.mxu0 %v4116_v31  ;;  %v3751_v0 = vclamps-f32 %v5156_v5, 10.0 }
 0x1aa   : > { %v4238_v32 = vpop.eup %4237  ;;  %4255 = vrcp.f32 %v1819_v56  ;;  %v1820_v35 = vadd.f32 1.0, %v4236_v50  ;;  %v3752_v18 = vclamps-f32 %v5160_v21, 10.0  ;;  %v5295_v34 = vpop.f32.mrb[33].mxu1  ;;  %v3755_v42 = vclamps-f32 %v5165_v61, 10.0  ;;  %v4117_v21 = vld [vmem:[%s4731_s25 + $0x160] ss:$8 sps:$4 sm:$0xff]  }
 0x1ab   : > { %v4240_v27 = vpop.eup %4239  ;;  %v3691_v38 = vclamps-f32 %v1999_v12, 10.0  ;;  %v1823_v43 = vadd.f32 1.0, %v4238_v32  ;;  %4257 = vpow2.f32 %v3651_v39  ;;  %v5298_v22 = vpop.f32.mrb[34].mxu1  ;;  %v5300_v10 = vmul.f32 %v3751_v0, %v3687_v25  ;;  %v4122_v61 = vld [vmem:[%s4731_s25 + $0x174] ss:$8 sps:$4 sm:$0xff]  }
 0x1ac   : > { %4259 = vrcp.f32 %v1820_v35  ;;  %v1824_v58 = vadd.f32 1.0, %v4240_v27  ;;  %v5302_v31 = vmul.f32 %v3752_v18, %v3688_v51  ;;  %v5304_v5 = vpop.f32.mrb[35].mxu1  ;;  %3015 = vmatpush1.bf16.msra.mxu0 %v4114_v52  ;;  %v3808_v33 = vclamps-f32 %v5255_v29, 10.0  ;;  %v4125_v12 = vld [vmem:[%s4731_s25 + $0x184] ss:$8 sps:$4 sm:$0xff]  }
 0x1ad   : > { %v4242_v46 = vpop.eup %4241  ;;  %4261 = vrcp.f32 %v1823_v43  ;;  %v3811_v19 = vclamps-f32 %v5261_v57, 10.0  ;;  %v5309_v13 = vmul.f32 %v3755_v42, %v3691_v38  ;;  %3016 = vmatprep.subr.bf16.mxu0 %v4119_v55  ;;  %v3756_v53 = vclamps-f32 %v5171_v15, 10.0  ;;  %v4120_v55 = vld [vmem:[%s4731_s25 + $0x170] ss:$8 sps:$4 sm:$0xff]  }
 0x1ae   : > { %v4244_v40 = vpop.eup %4243  ;;  %v2000_v47 = vmul.f32 %v4242_v46, %v5151_v17  ;;  %4263 = vrcp.f32 %v1824_v58  ;;  %v3807_v25 = vclamps-f32 %v5248_v2, 10.0  ;;  %v2488_v29 = vpack.c.bf16 %v3812_v4, %v3808_v33  ;;  %v4123_v58 = vld [vmem:[%s4731_s25 + $0x180] ss:$8 sps:$4 sm:$0xff]  }
 0x1af   : > { %v4246_v20 = vpop.eup %4245  ;;  %v2003_v52 = vmul.f32 %v4244_v40, %v5169_v62  ;;  %4265 = vpow2.f32 %v3652_v48  ;;  %v3759_v43 = vclamps-f32 %v5191_v26, 10.0  ;;  %v3760_v46 = vclamps-f32 %v5194_v23, 10.0 }
 0x1b0   : > { %v4248_v57 = vpop.eup %4247  ;;  %v3692_v56 = vclamps-f32 %v2000_v47, 10.0  ;;  %v2004_v39 = vmul.f32 %v4246_v20, %v5175_v14  ;;  %3017 = vmatpush1.bf16.msra.mxu0 %v4117_v21  ;;  %2953 = vmatprep.mubr.bf16.mxu0 %v2488_v29  ;;  %v2487_v51 = vpack.c.bf16 %v3811_v19, %v3807_v25  ;;  %v3763_v33 = vclamps-f32 %v5197_v11, 10.0  ;;  %v4128_v19 = vld [vmem:[%s4731_s25 + $0x194] ss:$8 sps:$4 sm:$0xff]  }
 0x1b1   : > { %v4250_v50 = vpop.eup %4249  ;;  %v2007_v17 = vmul.f32 %v4248_v57, %v5179_v3  ;;  %v5319_v15 = vpop.f32.mrb[36].mxu1  ;;  %3018 = vmatprep.subr.bf16.mxu0 %v4122_v61  ;;  %v3695_v2 = vclamps-f32 %v2003_v52, 10.0  ;;  %v3764_v26 = vclamps-f32 %v5206_v60, 10.0  ;;  %v3819_v52 = vclamps-f32 %v5309_v13, 10.0 }
 0x1b2   : > { %v4252_v62 = vpop.eup %4251  ;;  %v2008_v4 = vmul.f32 %v4250_v50, %v5182_v9  ;;  %v2320_v48 = vmul.f32 %v3756_v53, %v3692_v56  ;;  %v5323_v32 = vpop.f32.mrb[37].mxu1  ;;  %v3696_v35 = vclamps-f32 %v2004_v39, 10.0  ;;  %2954 = vmatmul.mubr.bf16.gmra.mrb[44].mxu0 %v2487_v51  ;;  %v4126_v39 = vld [vmem:[%s4731_s25 + $0x190] ss:$8 sps:$4 sm:$0xff]  }
 0x1b3   : > { %v4254_v14 = vpop.eup %4253  ;;  %v1827_v0 = vadd.f32 1.0, %v4252_v62  ;;  %v5325_v3 = vpop.f32.mrb[38].mxu1  ;;  %v3699_v27 = vclamps-f32 %v2007_v17, 10.0  ;;  %v5334_v47 = vmul.f32 %v3759_v43, %v3695_v2  ;;  %v4131_v17 = vld [vmem:[%s4731_s25 + $0x1a4] ss:$8 sps:$4 sm:$0xff]   ;;  %v3771_v43 = vclamps-f32 %v5245_v1, 10.0 }
 0x1b4   : > { %v4256_v18 = vpop.eup %4255  ;;  %v1828_v38 = vadd.f32 1.0, %v4254_v14  ;;  %v5328_v42 = vpop.f32.mrb[39].mxu1  ;;  %3019 = vmatpush1.bf16.msra.mxu0 %v4120_v55  ;;  %v3700_v21 = vclamps-f32 %v2008_v4, 10.0  ;;  %v3820_v25 = vclamps-f32 %v2320_v48, 10.0  ;;  %v5339_v23 = vmul.f32 %v3760_v46, %v3696_v35  ;;  %v4129_v35 = vld [vmem:[%s4731_s25 + $0x1a0] ss:$8 sps:$4 sm:$0xff]  }
 0x1b5   : > { %v4258_v9 = vpop.eup %4257  ;;  %4267 = vrcp.f32 %v1827_v0  ;;  %3020 = vmatprep.subr.bf16.mxu0 %v4125_v12  ;;  %v2011_v20 = vmul.f32 %v4256_v18, %v5204_v41  ;;  %v5343_v56 = vmul.f32 %v3763_v33, %v3699_v27  ;;  %v3816_v41 = vclamps-f32 %v5302_v31, 10.0  ;;  %v4134_v18 = vld [vmem:[%s4731_s25 + $0x1b4] ss:$8 sps:$4 sm:$0xff]  }
 0x1b6   : > { %v4260_v61 = vpop.eup %4259  ;;  %4269 = vrcp.f32 %v1828_v38  ;;  %v1831_v40 = vadd.f32 1.0, %v4258_v9  ;;  %v2328_v13 = vmul.f32 %v3764_v26, %v3700_v21  ;;  %v3593_v62 = vmul.f32 -1.442695, %v5289_v8 }
 0x1b7   : > { %v4262_v53 = vpop.eup %4261  ;;  %v2012_v29 = vmul.f32 %v4260_v61, %v5213_v7  ;;  %v3815_v7 = vclamps-f32 %v5300_v10, 10.0  ;;  %v3703_v12 = vclamps-f32 %v2011_v20, 10.0  ;;  %v2492_v2 = vpack.c.bf16 %v3820_v25, %v3816_v41 }
 0x1b8   : > { %v4264_v11 = vpop.eup %4263  ;;  %v2015_v57 = vmul.f32 %v4262_v53, %v5220_v28  ;;  %4271 = vrcp.f32 %v1831_v40  ;;  %3021 = vmatpush1.bf16.msra.mxu0 %v4123_v58  ;;  %v3767_v10 = vclamps-f32 %v5237_v44, 10.0  ;;  %v3594_v27 = vmul.f32 -1.442695, %v5295_v34 }
 0x1b9   : > { %v4266_v60 = vpop.eup %4265  ;;  %v2016_v55 = vmul.f32 %v4264_v11, %v5226_v6  ;;  %v5348_v50 = vpop.f32.mrb[40].mxu1  ;;  %3022 = vmatprep.subr.bf16.mxu0 %v4128_v19  ;;  %v3704_v6 = vclamps-f32 %v2012_v29, 10.0  ;;  %v2491_v48 = vpack.c.bf16 %v3819_v52, %v3815_v7  ;;  %2963 = vmatprep.mubr.bf16.mxu0 %v2492_v2  ;;  %v3768_v38 = vclamps-f32 %v5241_v49, 10.0  ;;  %v4132_v49 = vld [vmem:[%s4731_s25 + $0x1b0] ss:$8 sps:$4 sm:$0xff]  }
 0x1ba   : > { %v1832_v51 = vadd.f32 1.0, %v4266_v60  ;;  %v5352_v28 = vpop.f32.mrb[41].mxu1  ;;  %v3707_v31 = vclamps-f32 %v2015_v57, 10.0  ;;  %v3597_v9 = vmul.f32 -1.442695, %v5298_v22  ;;  %v5366_v21 = vmul.f32 %v3767_v10, %v3703_v12 }
 0x1bb   : > { %v5355_v4 = vpop.f32.mrb[42].mxu1  ;;  %v3708_v0 = vclamps-f32 %v2016_v55, 10.0  ;;  %2964 = vmatmul.mubr.bf16.gmra.mrb[48].mxu0 %v2491_v48  ;;  %v3772_v46 = vclamps-f32 %v5252_v37, 10.0  ;;  %v3828_v19 = vclamps-f32 %v2328_v13, 10.0  ;;  %v5370_v61 = vmul.f32 %v3768_v38, %v3704_v6  ;;  %v4137_v37 = vld [vmem:[%s4731_s25 + $0x1c4] ss:$8 sps:$4 sm:$0xff]  }
 0x1bc   : > { %4273 = vrcp.f32 %v1832_v51  ;;  %v5357_v14 = vpop.f32.mrb[43].mxu1  ;;  %3023 = vmatpush1.bf16.msra.mxu0 %v4126_v39  ;;  %v5372_v40 = vmul.f32 %v3771_v43, %v3707_v31  ;;  %v3598_v26 = vmul.f32 -1.442695, %v5304_v5  ;;  %v3827_v53 = vclamps-f32 %v5343_v56, 10.0  ;;  %v4135_v39 = vld [vmem:[%s4731_s25 + $0x1c0] ss:$8 sps:$4 sm:$0xff]  }
 0x1bd   : > { %3024 = vmatprep.subr.bf16.mxu0 %v4131_v17  ;;  %4275 = vpow2.f32 %v3593_v62  ;;  %v2336_v20 = vmul.f32 %v3772_v46, %v3708_v0  ;;  %v3824_v25 = vclamps-f32 %v5339_v23, 10.0  ;;  %v3601_v11 = vmul.f32 -1.442695, %v5319_v15  ;;  %v4140_v7 = vld [vmem:[%s4731_s25 + $0x1d4] ss:$8 sps:$4 sm:$0xff]  }
 0x1be   : > { %4277 = vpow2.f32 %v3594_v27  ;;  %v3823_v57 = vclamps-f32 %v5334_v47, 10.0  ;;  %v3602_v41 = vmul.f32 -1.442695, %v5323_v32  ;;  %v3605_v47 = vmul.f32 -1.442695, %v5325_v3 }
 0x1bf   : > { %v4268_v58 = vpop.eup %4267  ;;  %4279 = vpow2.f32 %v3597_v9  ;;  %v2496_v13 = vpack.c.bf16 %v3828_v19, %v3824_v25  ;;  %v3775_v12 = vclamps-f32 %v5276_v36, 10.0  ;;  %v3776_v62 = vclamps-f32 %v5281_v45, 10.0  ;;  %v4143_v43 = vld [vmem:[%s4731_s25 + $0x1e4] ss:$8 sps:$4 sm:$0xff]  }
 0x1c0   : > { %v4270_v44 = vpop.eup %4269  ;;  %v2019_v33 = vmul.f32 %v4268_v58, %v5250_v63  ;;  %3025 = vmatpush1.bf16.msra.mxu0 %v4129_v35  ;;  %4281 = vpow2.f32 %v3598_v26  ;;  %v2495_v51 = vpack.c.bf16 %v3827_v53, %v3823_v57  ;;  %v3606_v6 = vmul.f32 -1.442695, %v5328_v42 }
 0x1c1   : > { %v2020_v1 = vmul.f32 %v4270_v44, %v5258_v54  ;;  %v5378_v52 = vpop.f32.mrb[44].mxu1  ;;  %3026 = vmatprep.subr.bf16.mxu0 %v4134_v18  ;;  %4283 = vpow2.f32 %v3601_v11  ;;  %2973 = vmatprep.mubr.bf16.mxu0 %v2496_v13  ;;  %v3779_v31 = vclamps-f32 %v5285_v30, 10.0  ;;  %v3780_v48 = vclamps-f32 %v5291_v24, 10.0  ;;  %v4138_v18 = vld [vmem:[%s4731_s25 + $0x1d0] ss:$8 sps:$4 sm:$0xff]  }
 0x1c2   : > { %v4272_v63 = vpop.eup %4271  ;;  %v5383_v29 = vpop.f32.mrb[45].mxu1  ;;  %v3711_v60 = vclamps-f32 %v2019_v33, 10.0  ;;  %4285 = vpow2.f32 %v3602_v41  ;;  %v3836_v35 = vclamps-f32 %v2336_v20, 10.0  ;;  %v3609_v45 = vmul.f32 -1.442695, %v5348_v50 }
 0x1c3   : > { %v2023_v54 = vmul.f32 %v4272_v63, %v5263_v16  ;;  %v5387_v56 = vpop.f32.mrb[46].mxu1  ;;  %v3712_v55 = vclamps-f32 %v2020_v1, 10.0  ;;  %2974 = vmatmul.mubr.bf16.gmra.mrb[52].mxu0 %v2495_v51  ;;  %4287 = vpow2.f32 %v3605_v47  ;;  %v3832_v30 = vclamps-f32 %v5370_v61, 10.0  ;;  %v4146_v11 = vld [vmem:[%s4731_s25 + $0x1f4] ss:$8 sps:$4 sm:$0xff]  }
 0x1c4   : > { %v5391_v17 = vpop.f32.mrb[47].mxu1  ;;  %3027 = vmatpush1.bf16.msra.mxu0 %v4132_v49  ;;  %v2339_v0 = vmul.f32 %v3775_v12, %v3711_v60  ;;  %v3835_v24 = vclamps-f32 %v5372_v40, 10.0  ;;  %v3610_v58 = vmul.f32 -1.442695, %v5352_v28  ;;  %4289 = vpow2.f32 %v3606_v6  ;;  %v4144_v51 = vld [vmem:[%s4731_s25 + $0x1f0] ss:$8 sps:$4 sm:$0xff]  }
 0x1c5   : > { %v3715_v23 = vclamps-f32 %v2023_v54, 10.0  ;;  %3028 = vmatprep.subr.bf16.mxu0 %v4137_v37  ;;  %v2340_v10 = vmul.f32 %v3776_v62, %v3712_v55  ;;  %v3613_v46 = vmul.f32 -1.442695, %v5355_v4  ;;  %v3831_v49 = vclamps-f32 %v5366_v21, 10.0  ;;  %v4141_v37 = vld [vmem:[%s4731_s25 + $0x1e0] ss:$8 sps:$4 sm:$0xff]  }
 0x1c6   : > { %v4274_v16 = vpop.eup %4273  ;;  %v2500_v1 = vpack.c.bf16 %v3836_v35, %v3832_v30  ;;  %4291 = vpow2.f32 %v3609_v45  ;;  %v3614_v40 = vmul.f32 -1.442695, %v5357_v14  ;;  %v3839_v57 = vclamps-f32 %v2339_v0, 10.0 }
 0x1c7   : > { %v2024_v2 = vmul.f32 %v4274_v16, %v5268_v59  ;;  %v4276_v27 = vpop.eup %4275  ;;  %v2343_v38 = vmul.f32 %v3779_v31, %v3715_v23  ;;  %4293 = vpow2.f32 %v3610_v58  ;;  %v3840_v63 = vclamps-f32 %v2340_v10, 10.0 }
 0x1c8   : > { %3029 = vmatpush1.bf16.msra.mxu0 %v4135_v39  ;;  %v4278_v19 = vpop.eup %4277  ;;  %2983 = vmatprep.mubr.bf16.mxu0 %v2500_v1  ;;  %v2499_v25 = vpack.c.bf16 %v3835_v24, %v3831_v49  ;;  %v1773_v21 = vadd.f32 1.0, %v4276_v27  ;;  %4295 = vpow2.f32 %v3613_v46  ;;  %v3617_v6 = vmul.f32 -1.442695, %v5378_v52 }
 0x1c9   : > { %v3716_v36 = vclamps-f32 %v2024_v2, 10.0  ;;  %v5403_v59 = vpop.f32.mrb[48].mxu1  ;;  %3030 = vmatprep.subr.bf16.mxu0 %v4140_v7  ;;  %v4280_v61 = vpop.eup %4279  ;;  %v3843_v53 = vclamps-f32 %v2343_v38, 10.0  ;;  %v1774_v60 = vadd.f32 1.0, %v4278_v19  ;;  %4297 = vpow2.f32 %v3614_v40 }
 0x1ca   : > { %v5409_v9 = vpop.f32.mrb[49].mxu1  ;;  %v4282_v54 = vpop.eup %4281  ;;  %v1777_v41 = vadd.f32 1.0, %v4280_v61  ;;  %4299 = vrcp.f32 %v1773_v21  ;;  %v3618_v45 = vmul.f32 -1.442695, %v5383_v29  ;;  %v3621_v1 = vmul.f32 -1.442695, %v5387_v56 }
 0x1cb   : > { %v2344_v44 = vmul.f32 %v3780_v48, %v3716_v36  ;;  %v5412_v33 = vpop.f32.mrb[50].mxu1  ;;  %v4284_v39 = vpop.eup %4283  ;;  %2984 = vmatmul.mubr.bf16.gmra.mrb[56].mxu0 %v2499_v25  ;;  %v2503_v13 = vpack.c.bf16 %v3843_v53, %v3839_v57  ;;  %v1778_v16 = vadd.f32 1.0, %v4282_v54  ;;  %4301 = vrcp.f32 %v1774_v60 }
 0x1cc   : > { %v5415_v26 = vpop.f32.mrb[51].mxu1  ;;  %3031 = vmatpush1.bf16.msra.mxu0 %v4138_v18  ;;  %v4286_v7 = vpop.eup %4285  ;;  %v1781_v12 = vadd.f32 1.0, %v4284_v39  ;;  %4303 = vrcp.f32 %v1777_v41  ;;  %v3625_v25 = vmul.f32 -1.442695, %v5403_v59 }
 0x1cd   : > { %v3844_v20 = vclamps-f32 %v2344_v44, 10.0  ;;  %3032 = vmatprep.subr.bf16.mxu0 %v4143_v43  ;;  %v4288_v2 = vpop.eup %4287  ;;  %v1782_v35 = vadd.f32 1.0, %v4286_v7  ;;  %4305 = vrcp.f32 %v1778_v16  ;;  %v3629_v7 = vmul.f32 -1.442695, %v5412_v33 }
 0x1ce   : > { %v4290_v48 = vpop.eup %4289  ;;  %4307 = vrcp.f32 %v1781_v12  ;;  %v1785_v10 = vadd.f32 1.0, %v4288_v2 }
 0x1cf   : > { %v2504_v55 = vpack.c.bf16 %v3844_v20, %v3840_v63  ;;  %v1786_v27 = vadd.f32 1.0, %v4290_v48  ;;  %4309 = vpow2.f32 %v3617_v6  ;;  %v3622_v20 = vmul.f32 -1.442695, %v5391_v17 }
 0x1d0   : > { %3033 = vmatpush1.bf16.msra.mxu0 %v4141_v37  ;;  %v4292_v0 = vpop.eup %4291  ;;  %4311 = vrcp.f32 %v1782_v35 }
 0x1d1   : > { %v5420_v23 = vpop.f32.mrb[52].mxu1  ;;  %2993 = vmatprep.mubr.bf16.mxu0 %v2504_v55  ;;  %3034 = vmatprep.subr.bf16.mxu0 %v4146_v11  ;;  %v4294_v18 = vpop.eup %4293  ;;  %v1789_v43 = vadd.f32 1.0, %v4292_v0  ;;  %4313 = vrcp.f32 %v1785_v10  ;;  %v3630_v10 = vmul.f32 -1.442695, %v5415_v26 }
 0x1d2   : > { %v5423_v47 = vpop.f32.mrb[53].mxu1  ;;  %v4296_v36 = vpop.eup %4295  ;;  %v1790_v58 = vadd.f32 1.0, %v4294_v18  ;;  %4315 = vrcp.f32 %v1786_v27 }
 0x1d3   : > { %v5425_v62 = vpop.f32.mrb[54].mxu1  ;;  %2994 = vmatmul.mubr.bf16.gmra.mrb[60].mxu0 %v2503_v13  ;;  %v4298_v24 = vpop.eup %4297  ;;  %v1793_v44 = vadd.f32 1.0, %v4296_v36  ;;  %4317 = vpow2.f32 %v3618_v45  ;;  %v3626_v13 = vmul.f32 -1.442695, %v5409_v9  ;;  %v3634_v36 = vmul.f32 -1.442695, %v5423_v47 }
 0x1d4   : > { %v5428_v31 = vpop.f32.mrb[55].mxu1  ;;  %3035 = vmatpush1.bf16.msra.mxu0 %v4144_v51  ;;  %v4300_v49 = vpop.eup %4299  ;;  %4319 = vrcp.f32 %v1789_v43  ;;  %v1794_v40 = vadd.f32 1.0, %v4298_v24 }
 0x1d5   : > { %v4302_v61 = vpop.eup %4301  ;;  %4321 = vrcp.f32 %v1790_v58  ;;  %v1965_v21 = vmul.f32 %v4300_v49, %v5289_v8  ;;  %v3638_v24 = vmul.f32 -1.442695, %v5428_v31 }
 0x1d6   : > { %v4304_v53 = vpop.eup %4303  ;;  %4323 = vrcp.f32 %v1793_v44  ;;  %v1966_v57 = vmul.f32 %v4302_v61, %v5295_v34 }
 0x1d7   : > { %v4306_v37 = vpop.eup %4305  ;;  %4325 = vpow2.f32 %v3621_v1  ;;  %v1969_v55 = vmul.f32 %v4304_v53, %v5298_v22  ;;  %v3657_v6 = vclamps-f32 %v1965_v21, 10.0 }
 0x1d8   : > { %v4308_v63 = vpop.eup %4307  ;;  %4327 = vrcp.f32 %v1794_v40  ;;  %v1970_v41 = vmul.f32 %v4306_v37, %v5304_v5  ;;  %v3658_v22 = vclamps-f32 %v1966_v57, 10.0 }
 0x1d9   : > { %v5431_v38 = vpop.f32.mrb[56].mxu1  ;;  %v4310_v54 = vpop.eup %4309  ;;  %4329 = vpow2.f32 %v3622_v20  ;;  %v5457_v34 = vmul.f32 %v4308_v63, %v5319_v15  ;;  %v3661_v35 = vclamps-f32 %v1969_v55, 10.0  ;;  %v3633_v15 = vmul.f32 -1.442695, %v5420_v23 }
 0x1da   : > { %v5433_v30 = vpop.f32.mrb[57].mxu1  ;;  %v4312_v60 = vpop.eup %4311  ;;  %v1797_v12 = vadd.f32 1.0, %v4310_v54  ;;  %4331 = vpow2.f32 %v3625_v25  ;;  %v3662_v0 = vclamps-f32 %v1970_v41, 10.0  ;;  %v3641_v1 = vmul.f32 -1.442695, %v5431_v38 }
 0x1db   : > { %v5435_v46 = vpop.f32.mrb[58].mxu1  ;;  %v4314_v8 = vpop.eup %4313  ;;  %v5460_v5 = vmul.f32 %v4312_v60, %v5323_v32  ;;  %4333 = vpow2.f32 %v3626_v13  ;;  %v3665_v43 = vclamps-f32 %v5457_v34, 10.0  ;;  %v3637_v32 = vmul.f32 -1.442695, %v5425_v62 }
 0x1dc   : > { %v5437_v19 = vpop.f32.mrb[59].mxu1  ;;  %v4316_v2 = vpop.eup %4315  ;;  %v5464_v27 = vmul.f32 %v4314_v8, %v5325_v3  ;;  %4335 = vpow2.f32 %v3629_v7  ;;  %v3642_v37 = vmul.f32 -1.442695, %v5433_v30 }
 0x1dd   : > { %v4318_v48 = vpop.eup %4317  ;;  %4337 = vrcp.f32 %v1797_v12  ;;  %v3666_v49 = vclamps-f32 %v5460_v5, 10.0  ;;  %v5473_v3 = vmul.f32 %v4316_v2, %v5328_v42 }
 0x1de   : > { %v4320_v18 = vpop.eup %4319  ;;  %v1798_v20 = vadd.f32 1.0, %v4318_v48  ;;  %4339 = vpow2.f32 %v3630_v10  ;;  %v3669_v21 = vclamps-f32 %v5464_v27, 10.0 }
 0x1df   : > { %v4322_v45 = vpop.eup %4321  ;;  %4341 = vpow2.f32 %v3633_v15  ;;  %v5479_v41 = vmul.f32 %v4320_v18, %v5348_v50 }
 0x1e0   : > { %v4324_v44 = vpop.eup %4323  ;;  %4343 = vpow2.f32 %v3634_v36  ;;  %v5484_v8 = vmul.f32 %v4322_v45, %v5352_v28  ;;  %v3670_v28 = vclamps-f32 %v5473_v3, 10.0 }
 0x1e1   : > { %v5442_v11 = vpop.f32.mrb[60].mxu1  ;;  %v4326_v53 = vpop.eup %4325  ;;  %4345 = vpow2.f32 %v3637_v32  ;;  %v5487_v10 = vmul.f32 %v4324_v44, %v5355_v4  ;;  %v3673_v45 = vclamps-f32 %v5479_v41, 10.0 }
 0x1e2   : > { %v5446_v39 = vpop.f32.mrb[61].mxu1  ;;  %v4328_v54 = vpop.eup %4327  ;;  %v1801_v12 = vadd.f32 1.0, %v4326_v53  ;;  %4347 = vrcp.f32 %v1798_v20 }
 0x1e3   : > { %v5451_v51 = vpop.f32.mrb[62].mxu1  ;;  %v4330_v42 = vpop.eup %4329  ;;  %v5491_v50 = vmul.f32 %v4328_v54, %v5357_v14  ;;  %4349 = vpow2.f32 %v3638_v24 }
 0x1e4   : > { %v5454_v16 = vpop.f32.mrb[63].mxu1  ;;  %v4332_v48 = vpop.eup %4331  ;;  %4351 = vrcp.f32 %v1801_v12 }
 0x1e5   : > { %v4334_v36 = vpop.eup %4333  ;;  %4353 = vpow2.f32 %v3641_v1  ;;  %v3650_v1 = vmul.f32 -1.442695, %v5446_v39 }
 0x1e6   : > { %v4336_v32 = vpop.eup %4335  ;;  %v1806_v24 = vadd.f32 1.0, %v4334_v36 }
 0x1e9   : > { %v1500_v58 = vpop.f32.mrb[64].mxu1 }
 0x1ea   : > { %v3721_v61 = vclamps-f32 %v1500_v58, 10.0  ;;  %v1502_v40 = vpop.f32.mrb[65].mxu1  ;;  %v3674_v58 = vclamps-f32 %v5484_v8, 10.0 }
 0x1eb   : > { %v3722_v63 = vclamps-f32 %v1502_v40, 10.0  ;;  %v1504_v25 = vpop.f32.mrb[66].mxu1  ;;  %v3677_v40 = vclamps-f32 %v5487_v10, 10.0 }
 0x1ec   : > { %v2285_v57 = vmul.f32 %v3721_v61, %v3657_v6  ;;  %v3725_v60 = vclamps-f32 %v1504_v25, 10.0  ;;  %v1506_v55 = vpop.f32.mrb[67].mxu1  ;;  %v3645_v6 = vmul.f32 -1.442695, %v5435_v46  ;;  %v4338_v61 = vpop.eup %4337 }
 0x1ed   : > { %v5481_v13 = vmul.f32 %v3722_v63, %v3658_v22  ;;  %v3726_v7 = vclamps-f32 %v1506_v55, 10.0  ;;  %v1802_v22 = vadd.f32 1.0, %v4330_v42  ;;  %v3678_v63 = vclamps-f32 %v5491_v50, 10.0 }
 0x1ee   : > { %v2289_v2 = vmul.f32 %v3725_v60, %v3661_v35  ;;  %v3785_v18 = vclamps-f32 %v2285_v57, 10.0  ;;  %v3646_v35 = vmul.f32 -1.442695, %v5437_v19  ;;  %v4340_v57 = vpop.eup %4339  ;;  %v1809_v60 = vadd.f32 1.0, %v4336_v32 }
 0x1ef   : > { %v2290_v27 = vmul.f32 %v3726_v7, %v3662_v0  ;;  %v1805_v0 = vadd.f32 1.0, %v4332_v48  ;;  %4355 = vrcp.f32 %v1802_v22  ;;  %v3649_v55 = vmul.f32 -1.442695, %v5442_v11  ;;  %v4342_v12 = vpop.eup %4341 }
 0x1f0   : > { %v3789_v15 = vclamps-f32 %v2289_v2, 10.0  ;;  %v4344_v22 = vpop.eup %4343  ;;  %v1810_v34 = vadd.f32 1.0, %v4340_v57 }
 0x1f1   : > { %v1510_v4 = vpop.f32.mrb[68].mxu1  ;;  %v3790_v42 = vclamps-f32 %v2290_v27, 10.0  ;;  %4357 = vrcp.f32 %v1805_v0  ;;  %v4346_v27 = vpop.eup %4345  ;;  %v1813_v0 = vadd.f32 1.0, %v4342_v12 }
 0x1f2   : > { %v2477_v44 = vpack.c.bf16 %v3789_v15, %v3785_v18  ;;  %v1512_v14 = vpop.f32.mrb[69].mxu1  ;;  %v3729_v53 = vclamps-f32 %v1510_v4, 10.0  ;;  %v5506_v18 = vmul.f32 %v4338_v61, %v5378_v52  ;;  %4359 = vpow2.f32 %v3642_v37  ;;  %v4348_v32 = vpop.eup %4347 }
 0x1f3   : > { %v3730_v20 = vclamps-f32 %v1512_v14, 10.0  ;;  %v1514_v3 = vpop.f32.mrb[70].mxu1  ;;  %v3786_v15 = vclamps-f32 %v5481_v13, 10.0  ;;  %4361 = vrcp.f32 %v1806_v24  ;;  %v4350_v37 = vpop.eup %4349  ;;  %v3653_v13 = vmul.f32 -1.442695, %v5451_v51 }
 0x1f4   : > { %v3733_v25 = vclamps-f32 %v1514_v3, 10.0  ;;  %v1516_v54 = vpop.f32.mrb[71].mxu1  ;;  %v2293_v7 = vmul.f32 %v3729_v53, %v3665_v43  ;;  %4363 = vrcp.f32 %v1809_v60 }
 0x1f5   : > { %v2294_v2 = vmul.f32 %v3730_v20, %v3666_v49  ;;  %v3734_v36 = vclamps-f32 %v1516_v54, 10.0  ;;  %v2478_v5 = vpack.c.bf16 %v3790_v42, %v3786_v15  ;;  %4365 = vpow2.f32 %v3645_v6 }
 0x1f6   : > { %v2297_v48 = vmul.f32 %v3733_v25, %v3669_v21  ;;  %v3793_v43 = vclamps-f32 %v2293_v7, 10.0  ;;  %v1814_v21 = vadd.f32 1.0, %v4344_v22  ;;  %v1817_v20 = vadd.f32 1.0, %v4346_v27  ;;  %v4352_v25 = vpop.eup %4351 }
 0x1f7   : > { %v2298_v14 = vmul.f32 %v3734_v36, %v3670_v28  ;;  %4367 = vpow2.f32 %v3646_v35  ;;  %3036 = vmatprep.mubr.bf16.mxu0 %v2478_v5  ;;  %v4354_v60 = vpop.eup %4353  ;;  %v3654_v42 = vmul.f32 -1.442695, %v5454_v16  ;;  %v3794_v22 = vclamps-f32 %v2294_v2, 10.0 }
 0x1f8   : > { %v3797_v4 = vclamps-f32 %v2297_v48, 10.0  ;;  %4369 = vrcp.f32 %v1810_v34  ;;  %3037 = vmatmul.mubr.bf16.vlgmr.msra.gmra.mrb[32].mxu0 %v2477_v44  ;;  %v1990_v48 = vmul.f32 %v4348_v32, %v5383_v29  ;;  %v1993_v41 = vmul.f32 %v4352_v25, %v5387_v56 }
 0x1f9   : > { %v1520_v49 = vpop.f32.mrb[72].mxu1  ;;  %v3798_v54 = vclamps-f32 %v2298_v14, 10.0  ;;  %4371 = vrcp.f32 %v1813_v0  ;;  %v4356_v12 = vpop.eup %4355  ;;  %v3681_v56 = vclamps-f32 %v5506_v18, 10.0 }
 0x1fa   : > { %v3737_v53 = vclamps-f32 %v1520_v49, 10.0  ;;  %v1522_v52 = vpop.f32.mrb[73].mxu1  ;;  %v2481_v61 = vpack.c.bf16 %v3797_v4, %v3793_v43  ;;  %4373 = vrcp.f32 %v1814_v21  ;;  %v1994_v29 = vmul.f32 %v4356_v12, %v5391_v17 }
 0x1fb   : > { %v3738_v3 = vclamps-f32 %v1522_v52, 10.0  ;;  %v1524_v24 = vpop.f32.mrb[74].mxu1  ;;  %4375 = vrcp.f32 %v1817_v20  ;;  %v4358_v36 = vpop.eup %4357  ;;  %v2482_v27 = vpack.c.bf16 %v3798_v54, %v3794_v22  ;;  %v3685_v17 = vclamps-f32 %v1993_v41, 10.0 }
 0x1fc   : > { %v2301_v28 = vmul.f32 %v3737_v53, %v3673_v45  ;;  %v3741_v57 = vclamps-f32 %v1524_v24, 10.0  ;;  %v1526_v6 = vpop.f32.mrb[75].mxu1  ;;  %v1818_v45 = vadd.f32 1.0, %v4350_v37  ;;  %4377 = vpow2.f32 %v3649_v55  ;;  %v4360_v34 = vpop.eup %4359 }
 0x1fd   : > { %v2302_v35 = vmul.f32 %v3738_v3, %v3674_v58  ;;  %v3742_v7 = vclamps-f32 %v1526_v6, 10.0  ;;  %4379 = vpow2.f32 %v3650_v1  ;;  %3046 = vmatprep.mubr.bf16.mxu0 %v2482_v27  ;;  %v3682_v55 = vclamps-f32 %v1990_v48, 10.0 }
 0x1fe   : > { %v2305_v44 = vmul.f32 %v3741_v57, %v3677_v40  ;;  %v3801_v8 = vclamps-f32 %v2301_v28, 10.0  ;;  %v4362_v40 = vpop.eup %4361  ;;  %4381 = vpow2.f32 %v3653_v13  ;;  %v3686_v18 = vclamps-f32 %v1994_v29, 10.0 }
 0x1ff   : > { %v2306_v15 = vmul.f32 %v3742_v7, %v3678_v63  ;;  %v3802_v2 = vclamps-f32 %v2302_v35, 10.0  ;;  %v4364_v32 = vpop.eup %4363  ;;  %4383 = vpow2.f32 %v3654_v42  ;;  %v1821_v37 = vadd.f32 1.0, %v4354_v60 }
 0x200   : > { %v3805_v58 = vclamps-f32 %v2305_v44, 10.0  ;;  %v4366_v49 = vpop.eup %4365  ;;  %4385 = vrcp.f32 %v1818_v45  ;;  %3047 = vmatmul.mubr.bf16.gmra.mrb[36].mxu0 %v2481_v61  ;;  %v1997_v24 = vmul.f32 %v4358_v36, %v5403_v59  ;;  %v1822_v25 = vadd.f32 1.0, %v4360_v34 }
 0x201   : > { %v3806_v43 = vclamps-f32 %v2306_v15, 10.0  ;;  %v1530_v10 = vpop.f32.mrb[76].mxu1  ;;  %v4368_v52 = vpop.eup %4367  ;;  %v1998_v57 = vmul.f32 %v4362_v40, %v5409_v9  ;;  %v1825_v6 = vadd.f32 1.0, %v4366_v49  ;;  %v2001_v35 = vmul.f32 %v4364_v32, %v5412_v33 }
 0x202   : > { %v3745_v4 = vclamps-f32 %v1530_v10, 10.0  ;;  %v1532_v50 = vpop.f32.mrb[77].mxu1  ;;  %v2485_v63 = vpack.c.bf16 %v3805_v58, %v3801_v8  ;;  %v4370_v3 = vpop.eup %4369  ;;  %v1826_v7 = vadd.f32 1.0, %v4368_v52  ;;  %4387 = vrcp.f32 %v1821_v37 }
 0x203   : > { %v3746_v0 = vclamps-f32 %v1532_v50, 10.0  ;;  %v1534_v14 = vpop.f32.mrb[78].mxu1  ;;  %v2486_v5 = vpack.c.bf16 %v3806_v43, %v3802_v2  ;;  %v4372_v28 = vpop.eup %4371  ;;  %v2002_v22 = vmul.f32 %v4370_v3, %v5415_v26  ;;  %v3689_v15 = vclamps-f32 %v1997_v24, 10.0 }
 0x204   : > { %v2309_v1 = vmul.f32 %v3745_v4, %v3681_v56  ;;  %v3749_v21 = vclamps-f32 %v1534_v14, 10.0  ;;  %v1536_v53 = vpop.f32.mrb[79].mxu1  ;;  %v4374_v61 = vpop.eup %4373  ;;  %4389 = vrcp.f32 %v1822_v25  ;;  %v3690_v27 = vclamps-f32 %v1998_v57, 10.0 }
 0x205   : > { %v2310_v20 = vmul.f32 %v3746_v0, %v3682_v55  ;;  %v3750_v13 = vclamps-f32 %v1536_v53, 10.0  ;;  %3056 = vmatprep.mubr.bf16.mxu0 %v2486_v5  ;;  %v4376_v60 = vpop.eup %4375  ;;  %4391 = vrcp.f32 %v1825_v6  ;;  %v3693_v43 = vclamps-f32 %v2001_v35, 10.0 }
 0x206   : > { %v2313_v54 = vmul.f32 %v3749_v21, %v3685_v17  ;;  %v3809_v12 = vclamps-f32 %v2309_v1, 10.0  ;;  %v4378_v45 = vpop.eup %4377  ;;  %4393 = vrcp.f32 %v1826_v7  ;;  %v3694_v4 = vclamps-f32 %v2002_v22, 10.0 }
 0x207   : > { %v2314_v42 = vmul.f32 %v3750_v13, %v3686_v18  ;;  %v3810_v44 = vclamps-f32 %v2310_v20, 10.0  ;;  %v4380_v58 = vpop.eup %4379  ;;  %v1829_v50 = vadd.f32 1.0, %v4378_v45  ;;  %v2005_v14 = vmul.f32 %v4372_v28, %v5420_v23 }
 0x208   : > { %v3813_v48 = vclamps-f32 %v2313_v54, 10.0  ;;  %v4382_v2 = vpop.eup %4381  ;;  %3057 = vmatmul.mubr.bf16.gmra.mrb[40].mxu0 %v2485_v63  ;;  %v1830_v5 = vadd.f32 1.0, %v4380_v58  ;;  %v2006_v17 = vmul.f32 %v4374_v61, %v5423_v47  ;;  %v2009_v63 = vmul.f32 %v4376_v60, %v5425_v62 }
 0x209   : > { %v3814_v41 = vclamps-f32 %v2314_v42, 10.0  ;;  %v1540_v59 = vpop.f32.mrb[80].mxu1  ;;  %v4384_v56 = vpop.eup %4383  ;;  %v1833_v1 = vadd.f32 1.0, %v4382_v2  ;;  %4395 = vrcp.f32 %v1829_v50  ;;  %v3697_v24 = vclamps-f32 %v2005_v14, 10.0 }
 0x20a   : > { %v3753_v36 = vclamps-f32 %v1540_v59, 10.0  ;;  %v1542_v9 = vpop.f32.mrb[81].mxu1  ;;  %v2489_v8 = vpack.c.bf16 %v3813_v48, %v3809_v12  ;;  %v4386_v0 = vpop.eup %4385  ;;  %v1834_v53 = vadd.f32 1.0, %v4384_v56  ;;  %4397 = vrcp.f32 %v1830_v5 }
 0x20b   : > { %v3754_v33 = vclamps-f32 %v1542_v9, 10.0  ;;  %v1544_v34 = vpop.f32.mrb[82].mxu1  ;;  %v2490_v29 = vpack.c.bf16 %v3814_v41, %v3810_v44  ;;  %v2010_v37 = vmul.f32 %v4386_v0, %v5428_v31  ;;  %v3698_v47 = vclamps-f32 %v2006_v17, 10.0 }
 0x20c   : > { %v2317_v26 = vmul.f32 %v3753_v36, %v3689_v15  ;;  %v3757_v10 = vclamps-f32 %v1544_v34, 10.0  ;;  %v1546_v40 = vpop.f32.mrb[83].mxu1  ;;  %v4388_v28 = vpop.eup %4387  ;;  %4399 = vrcp.f32 %v1833_v1  ;;  %v3701_v61 = vclamps-f32 %v2009_v63, 10.0 }
 0x20d   : > { %v2318_v32 = vmul.f32 %v3754_v33, %v3690_v27  ;;  %v3758_v55 = vclamps-f32 %v1546_v40, 10.0  ;;  %3066 = vmatprep.mubr.bf16.mxu0 %v2490_v29  ;;  %4401 = vrcp.f32 %v1834_v53  ;;  %v3702_v48 = vclamps-f32 %v2010_v37, 10.0 }
 0x20e   : > { %v2321_v49 = vmul.f32 %v3757_v10, %v3693_v43  ;;  %v3817_v52 = vclamps-f32 %v2317_v26, 10.0  ;;  %v4390_v42 = vpop.eup %4389  ;;  %v2013_v41 = vmul.f32 %v4388_v28, %v5431_v38 }
 0x20f   : > { %v2322_v21 = vmul.f32 %v3758_v55, %v3694_v4  ;;  %v3818_v20 = vclamps-f32 %v2318_v32, 10.0  ;;  %v4392_v12 = vpop.eup %4391  ;;  %v2014_v45 = vmul.f32 %v4390_v42, %v5433_v30 }
 0x210   : > { %v3821_v18 = vclamps-f32 %v2321_v49, 10.0  ;;  %3067 = vmatmul.mubr.bf16.gmra.mrb[44].mxu0 %v2489_v8  ;;  %v4394_v44 = vpop.eup %4393  ;;  %v2017_v36 = vmul.f32 %v4392_v12, %v5435_v46  ;;  %v3705_v29 = vclamps-f32 %v2013_v41, 10.0 }
 0x211   : > { %v3822_v13 = vclamps-f32 %v2322_v21, 10.0  ;;  %v1550_v3 = vpop.f32.mrb[84].mxu1  ;;  %v2018_v8 = vmul.f32 %v4394_v44, %v5437_v19  ;;  %v3706_v40 = vclamps-f32 %v2014_v45, 10.0 }
 0x212   : > { %v3761_v23 = vclamps-f32 %v1550_v3, 10.0  ;;  %v1552_v25 = vpop.f32.mrb[85].mxu1  ;;  %v2493_v54 = vpack.c.bf16 %v3821_v18, %v3817_v52  ;;  %v3709_v50 = vclamps-f32 %v2017_v36, 10.0 }
 0x213   : > { %v3762_v57 = vclamps-f32 %v1552_v25, 10.0  ;;  %v1554_v6 = vpop.f32.mrb[86].mxu1  ;;  %v2494_v62 = vpack.c.bf16 %v3822_v13, %v3818_v20  ;;  %v4396_v10 = vpop.eup %4395  ;;  %v3710_v19 = vclamps-f32 %v2018_v8, 10.0 }
 0x214   : > { %v2325_v31 = vmul.f32 %v3761_v23, %v3697_v24  ;;  %v3765_v35 = vclamps-f32 %v1554_v6, 10.0  ;;  %v1556_v7 = vpop.f32.mrb[87].mxu1  ;;  %v4398_v30 = vpop.eup %4397  ;;  %v2021_v17 = vmul.f32 %v4396_v10, %v5442_v11 }
 0x215   : > { %v2326_v60 = vmul.f32 %v3762_v57, %v3698_v47  ;;  %v3766_v22 = vclamps-f32 %v1556_v7, 10.0  ;;  %3076 = vmatprep.mubr.bf16.mxu0 %v2494_v62  ;;  %v2022_v21 = vmul.f32 %v4398_v30, %v5446_v39 }
 0x216   : > { %v2329_v59 = vmul.f32 %v3765_v35, %v3701_v61  ;;  %v3825_v9 = vclamps-f32 %v2325_v31, 10.0  ;;  %v4400_v0 = vpop.eup %4399  ;;  %v3713_v24 = vclamps-f32 %v2021_v17, 10.0 }
 0x217   : > { %v2330_v15 = vmul.f32 %v3766_v22, %v3702_v48  ;;  %v3826_v27 = vclamps-f32 %v2326_v60, 10.0  ;;  %v4402_v49 = vpop.eup %4401  ;;  %v2025_v53 = vmul.f32 %v4400_v0, %v5451_v51  ;;  %v3714_v28 = vclamps-f32 %v2022_v21, 10.0 }
 0x218   : > { %v3829_v58 = vclamps-f32 %v2329_v59, 10.0  ;;  %3077 = vmatmul.mubr.bf16.gmra.mrb[48].mxu0 %v2493_v54  ;;  %v2026_v37 = vmul.f32 %v4402_v49, %v5454_v16 }
 0x219   : > { %v3830_v33 = vclamps-f32 %v2330_v15, 10.0  ;;  %v1560_v34 = vpop.f32.mrb[88].mxu1  ;;  %v3717_v6 = vclamps-f32 %v2025_v53, 10.0 }
 0x21a   : > { %v3769_v2 = vclamps-f32 %v1560_v34, 10.0  ;;  %v1562_v43 = vpop.f32.mrb[89].mxu1  ;;  %v2497_v26 = vpack.c.bf16 %v3829_v58, %v3825_v9  ;;  %v3718_v42 = vclamps-f32 %v2026_v37, 10.0 }
 0x21b   : > { %v3770_v38 = vclamps-f32 %v1562_v43, 10.0  ;;  %v1564_v56 = vpop.f32.mrb[90].mxu1  ;;  %v2498_v4 = vpack.c.bf16 %v3830_v33, %v3826_v27 }
 0x21c   : > { %v2333_v46 = vmul.f32 %v3769_v2, %v3705_v29  ;;  %v3773_v32 = vclamps-f32 %v1564_v56, 10.0  ;;  %v1566_v55 = vpop.f32.mrb[91].mxu1 }
 0x21d   : > { %v2334_v14 = vmul.f32 %v3770_v38, %v3706_v40  ;;  %v3774_v5 = vclamps-f32 %v1566_v55, 10.0  ;;  %3086 = vmatprep.mubr.bf16.mxu0 %v2498_v4 }
 0x21e   : > { %v2337_v1 = vmul.f32 %v3773_v32, %v3709_v50  ;;  %v3833_v52 = vclamps-f32 %v2333_v46, 10.0 }
 0x21f   : > { %v2338_v63 = vmul.f32 %v3774_v5, %v3710_v19  ;;  %v3834_v20 = vclamps-f32 %v2334_v14, 10.0 }
 0x220   : > { %v3837_v18 = vclamps-f32 %v2337_v1, 10.0  ;;  %3087 = vmatmul.mubr.bf16.gmra.mrb[52].mxu0 %v2497_v26 }
 0x221   : > { %v3838_v13 = vclamps-f32 %v2338_v63, 10.0  ;;  %v1570_v3 = vpop.f32.mrb[92].mxu1 }
 0x222   : > { %v3777_v23 = vclamps-f32 %v1570_v3, 10.0  ;;  %v1572_v25 = vpop.f32.mrb[93].mxu1  ;;  %v2501_v54 = vpack.c.bf16 %v3837_v18, %v3833_v52 }
 0x223   : > { %v3778_v47 = vclamps-f32 %v1572_v25, 10.0  ;;  %v1574_v11 = vpop.f32.mrb[94].mxu1  ;;  %v2502_v57 = vpack.c.bf16 %v3838_v13, %v3834_v20 }
 0x224   : > { %v2341_v39 = vmul.f32 %v3777_v23, %v3713_v24  ;;  %v3781_v62 = vclamps-f32 %v1574_v11, 10.0  ;;  %v1576_v51 = vpop.f32.mrb[95].mxu1 }
 0x225   : > { %v2342_v61 = vmul.f32 %v3778_v47, %v3714_v28  ;;  %v3782_v31 = vclamps-f32 %v1576_v51, 10.0  ;;  %3096 = vmatprep.mubr.bf16.mxu0 %v2502_v57 }
 0x226   : > { %v2345_v16 = vmul.f32 %v3781_v62, %v3717_v6  ;;  %v3841_v7 = vclamps-f32 %v2341_v39, 10.0 }
 0x227   : > { %v2346_v35 = vmul.f32 %v3782_v31, %v3718_v42  ;;  %v3842_v48 = vclamps-f32 %v2342_v61, 10.0 }
 0x228   : > { %v3845_v12 = vclamps-f32 %v2345_v16, 10.0  ;;  %3097 = vmatmul.mubr.bf16.gmra.mrb[56].mxu0 %v2501_v54 }
 0x229   : > { %v3846_v60 = vclamps-f32 %v2346_v35, 10.0 }
 0x22a   : > { %v2505_v22 = vpack.c.bf16 %v3845_v12, %v3841_v7 }
 0x22b   : > { %v2506_v44 = vpack.c.bf16 %v3846_v60, %v3842_v48 }
 0x22d   : > { %3106 = vmatprep.mubr.bf16.mxu0 %v2506_v44 }
 0x230   : > { %3107 = vmatmul.mubr.bf16.gmra.mrb[60].mxu0 %v2505_v22 }
 0x2cb   : > { %v5539_v41 = vpop.f32.mrb[32].mxu0 }
 0x2cc   : > { %v5541_v59 = vpop.f32.mrb[33].mxu0  ;;  %3121 = vst [vmem:[#allocation2] sm:$0xff] (!%p3911_p9), %v5539_v41 }
 0x2cd   : > { %v5543_v45 = vpop.f32.mrb[34].mxu0  ;;  %3122 = vst [vmem:[#allocation2 + $0x8] sm:$0xff] (!%p3911_p9), %v5541_v59 }
 0x2ce   : > { %v5545_v15 = vpop.f32.mrb[35].mxu0  ;;  %3123 = vst [vmem:[#allocation2 + $0x10] sm:$0xff] (!%p3911_p9), %v5543_v45 }
 0x2cf   : > { %3124 = vst [vmem:[#allocation2 + $0x18] sm:$0xff] (!%p3911_p9), %v5545_v15 }
 0x2d3   : > { %v5547_v36 = vpop.f32.mrb[36].mxu0 }
 0x2d4   : > { %v5549_v9 = vpop.f32.mrb[37].mxu0  ;;  %3125 = vst [vmem:[#allocation2 + $0x20] sm:$0xff] (!%p3911_p9), %v5547_v36 }
 0x2d5   : > { %v5551_v58 = vpop.f32.mrb[38].mxu0  ;;  %3126 = vst [vmem:[#allocation2 + $0x28] sm:$0xff] (!%p3911_p9), %v5549_v9 }
 0x2d6   : > { %v5553_v8 = vpop.f32.mrb[39].mxu0  ;;  %3127 = vst [vmem:[#allocation2 + $0x30] sm:$0xff] (!%p3911_p9), %v5551_v58 }
 0x2d7   : > { %3128 = vst [vmem:[#allocation2 + $0x38] sm:$0xff] (!%p3911_p9), %v5553_v8 }
 0x2db   : > { %v5555_v27 = vpop.f32.mrb[40].mxu0 }
 0x2dc   : > { %v5557_v33 = vpop.f32.mrb[41].mxu0  ;;  %3129 = vst [vmem:[#allocation2 + $0x40] sm:$0xff] (!%p3911_p9), %v5555_v27 }
 0x2dd   : > { %v5559_v34 = vpop.f32.mrb[42].mxu0  ;;  %3130 = vst [vmem:[#allocation2 + $0x48] sm:$0xff] (!%p3911_p9), %v5557_v33 }
 0x2de   : > { %v5561_v29 = vpop.f32.mrb[43].mxu0  ;;  %3131 = vst [vmem:[#allocation2 + $0x50] sm:$0xff] (!%p3911_p9), %v5559_v34 }
 0x2df   : > { %3132 = vst [vmem:[#allocation2 + $0x58] sm:$0xff] (!%p3911_p9), %v5561_v29 }
 0x2e3   : > { %v5563_v2 = vpop.f32.mrb[44].mxu0 }
 0x2e4   : > { %v5565_v43 = vpop.f32.mrb[45].mxu0  ;;  %3133 = vst [vmem:[#allocation2 + $0x60] sm:$0xff] (!%p3911_p9), %v5563_v2 }
 0x2e5   : > { %v5567_v26 = vpop.f32.mrb[46].mxu0  ;;  %3134 = vst [vmem:[#allocation2 + $0x68] sm:$0xff] (!%p3911_p9), %v5565_v43 }
 0x2e6   : > { %v5569_v10 = vpop.f32.mrb[47].mxu0  ;;  %3135 = vst [vmem:[#allocation2 + $0x70] sm:$0xff] (!%p3911_p9), %v5567_v26 }
 0x2e7   : > { %3136 = vst [vmem:[#allocation2 + $0x78] sm:$0xff] (!%p3911_p9), %v5569_v10 }
 0x2eb   : > { %v5571_v40 = vpop.f32.mrb[48].mxu0 }
 0x2ec   : > { %v5573_v38 = vpop.f32.mrb[49].mxu0  ;;  %3137 = vst [vmem:[#allocation2 + $0x80] sm:$0xff] (!%p3911_p9), %v5571_v40 }
 0x2ed   : > { %v5575_v56 = vpop.f32.mrb[50].mxu0  ;;  %3138 = vst [vmem:[#allocation2 + $0x88] sm:$0xff] (!%p3911_p9), %v5573_v38 }
 0x2ee   : > { %v5577_v4 = vpop.f32.mrb[51].mxu0  ;;  %3139 = vst [vmem:[#allocation2 + $0x90] sm:$0xff] (!%p3911_p9), %v5575_v56 }
 0x2ef   : > { %3140 = vst [vmem:[#allocation2 + $0x98] sm:$0xff] (!%p3911_p9), %v5577_v4 }
 0x2f3   : > { %v5579_v30 = vpop.f32.mrb[52].mxu0 }
 0x2f4   : > { %v5581_v50 = vpop.f32.mrb[53].mxu0  ;;  %3141 = vst [vmem:[#allocation2 + $0xa0] sm:$0xff] (!%p3911_p9), %v5579_v30 }
 0x2f5   : > { %v5583_v46 = vpop.f32.mrb[54].mxu0  ;;  %3142 = vst [vmem:[#allocation2 + $0xa8] sm:$0xff] (!%p3911_p9), %v5581_v50 }
 0x2f6   : > { %v5585_v32 = vpop.f32.mrb[55].mxu0  ;;  %3143 = vst [vmem:[#allocation2 + $0xb0] sm:$0xff] (!%p3911_p9), %v5583_v46 }
 0x2f7   : > { %3144 = vst [vmem:[#allocation2 + $0xb8] sm:$0xff] (!%p3911_p9), %v5585_v32 }
 0x2fb   : > { %v5587_v55 = vpop.f32.mrb[56].mxu0 }
 0x2fc   : > { %v5589_v0 = vpop.f32.mrb[57].mxu0  ;;  %3145 = vst [vmem:[#allocation2 + $0xc0] sm:$0xff] (!%p3911_p9), %v5587_v55 }
 0x2fd   : > { %v5591_v19 = vpop.f32.mrb[58].mxu0  ;;  %3146 = vst [vmem:[#allocation2 + $0xc8] sm:$0xff] (!%p3911_p9), %v5589_v0 }
 0x2fe   : > { %v5593_v14 = vpop.f32.mrb[59].mxu0  ;;  %3147 = vst [vmem:[#allocation2 + $0xd0] sm:$0xff] (!%p3911_p9), %v5591_v19 }
 0x2ff   : > { %3148 = vst [vmem:[#allocation2 + $0xd8] sm:$0xff] (!%p3911_p9), %v5593_v14 }
 0x300   : > { %3120 = sbr.rel (%p3911_p9) target bundleno = 776 (0x308), region = 44 }
 0x303   : > { %v5595_v5 = vpop.f32.mrb[60].mxu0 }
 0x304   : > { %v5597_v49 = vpop.f32.mrb[61].mxu0  ;;  %3149 = vst [vmem:[#allocation2 + $0xe0] sm:$0xff] (!%p3911_p9), %v5595_v5 }
 0x305   : > { %v5599_v17 = vpop.f32.mrb[62].mxu0  ;;  %3150 = vst [vmem:[#allocation2 + $0xe8] sm:$0xff] (!%p3911_p9), %v5597_v49 }
 0x306   : > { %v5601_v1 = vpop.f32.mrb[63].mxu0  ;;  %3151 = vst [vmem:[#allocation2 + $0xf0] sm:$0xff] (!%p3911_p9), %v5599_v17 }
 0x307   : > { %3152 = vst [vmem:[#allocation2 + $0xf8] sm:$0xff] %v5601_v1 }
 0x308 PF: > { %p3912_p12 = scmp.le.s32.totalorder %s4540_s15, 0 }
 0x309   : > { %v3157_v21 = vld [vmem:[#allocation2] sm:$0xff] (!%p3912_p12)  ;;  %v3158_v63 = vld [vmem:[#allocation2 + $0x8] sm:$0xff] (!%p3912_p12)  ;;  %v3159_v53 = vld [vmem:[#allocation2 + $0x10] sm:$0xff] (!%p3912_p12) }
 0x30a   : > { %3156 = sbr.rel (%p3912_p12) target bundleno = 796 (0x31c), region = 48  ;;  %v3189_v52 = vadd.f32 (!%p3912_p12), %v3157_v21, %v5539_v41  ;;  %v3190_v18 = vadd.f32 (!%p3912_p12), %v3158_v63, %v5541_v59  ;;  %v3191_v37 = vadd.f32 (!%p3912_p12), %v3159_v53, %v5543_v45  ;;  %v3160_v20 = vld [vmem:[#allocation2 + $0x18] sm:$0xff] (!%p3912_p12)  ;;  %v3161_v13 = vld [vmem:[#allocation2 + $0x20] sm:$0xff] (!%p3912_p12)  ;;  %v3162_v3 = vld [vmem:[#allocation2 + $0x28] sm:$0xff] (!%p3912_p12) }
 0x30b   : > { %v3192_v24 = vadd.f32 (!%p3912_p12), %v3160_v20, %v5545_v15  ;;  %v3193_v23 = vadd.f32 (!%p3912_p12), %v3161_v13, %v5547_v36  ;;  %v3194_v25 = vadd.f32 (!%p3912_p12), %v3162_v3, %v5549_v9  ;;  %v3163_v54 = vld [vmem:[#allocation2 + $0x30] sm:$0xff] (!%p3912_p12)  ;;  %v3164_v28 = vld [vmem:[#allocation2 + $0x38] sm:$0xff] (!%p3912_p12)  ;;  %v3165_v47 = vld [vmem:[#allocation2 + $0x40] sm:$0xff] (!%p3912_p12) }
 0x30c   : > { %3221 = vst [vmem:[#allocation2] sm:$0xff] (!%p3912_p12), %v3189_v52  ;;  %3222 = vst [vmem:[#allocation2 + $0x8] sm:$0xff] (!%p3912_p12), %v3190_v18  ;;  %v3195_v11 = vadd.f32 (!%p3912_p12), %v3163_v54, %v5551_v58  ;;  %v3196_v57 = vadd.f32 (!%p3912_p12), %v3164_v28, %v5553_v8  ;;  %v3197_v6 = vadd.f32 (!%p3912_p12), %v3165_v47, %v5555_v27  ;;  %v3166_v39 = vld [vmem:[#allocation2 + $0x48] sm:$0xff] (!%p3912_p12)  ;;  %v3167_v62 = vld [vmem:[#allocation2 + $0x50] sm:$0xff] (!%p3912_p12) }
 0x30d   : > { %3223 = vst [vmem:[#allocation2 + $0x10] sm:$0xff] (!%p3912_p12), %v3191_v37  ;;  %v3168_v51 = vld [vmem:[#allocation2 + $0x58] sm:$0xff] (!%p3912_p12)  ;;  %3224 = vst [vmem:[#allocation2 + $0x18] sm:$0xff] (!%p3912_p12), %v3192_v24  ;;  %v3198_v42 = vadd.f32 (!%p3912_p12), %v3166_v39, %v5557_v33  ;;  %v3199_v61 = vadd.f32 (!%p3912_p12), %v3167_v62, %v5559_v34  ;;  %v3169_v16 = vld [vmem:[#allocation2 + $0x60] sm:$0xff] (!%p3912_p12) }
 0x30e   : > { %3225 = vst [vmem:[#allocation2 + $0x20] sm:$0xff] (!%p3912_p12), %v3193_v23  ;;  %3226 = vst [vmem:[#allocation2 + $0x28] sm:$0xff] (!%p3912_p12), %v3194_v25  ;;  %v3200_v31 = vadd.f32 (!%p3912_p12), %v3168_v51, %v5561_v29  ;;  %v3170_v35 = vld [vmem:[#allocation2 + $0x68] sm:$0xff] (!%p3912_p12)  ;;  %v3171_v7 = vld [vmem:[#allocation2 + $0x70] sm:$0xff] (!%p3912_p12)  ;;  %v3201_v12 = vadd.f32 (!%p3912_p12), %v3169_v16, %v5563_v2 }
 0x30f   : > { %3227 = vst [vmem:[#allocation2 + $0x30] sm:$0xff] (!%p3912_p12), %v3195_v11  ;;  %3228 = vst [vmem:[#allocation2 + $0x38] sm:$0xff] (!%p3912_p12), %v3196_v57  ;;  %v3202_v48 = vadd.f32 (!%p3912_p12), %v3170_v35, %v5565_v43  ;;  %v3203_v60 = vadd.f32 (!%p3912_p12), %v3171_v7, %v5567_v26  ;;  %v3172_v22 = vld [vmem:[#allocation2 + $0x78] sm:$0xff] (!%p3912_p12)  ;;  %v3173_v44 = vld [vmem:[#allocation2 + $0x80] sm:$0xff] (!%p3912_p12) }
 0x310   : > { %3229 = vst [vmem:[#allocation2 + $0x40] sm:$0xff] (!%p3912_p12), %v3197_v6  ;;  %v3174_v41 = vld [vmem:[#allocation2 + $0x88] sm:$0xff] (!%p3912_p12)  ;;  %3230 = vst [vmem:[#allocation2 + $0x48] sm:$0xff] (!%p3912_p12), %v3198_v42  ;;  %v3204_v59 = vadd.f32 (!%p3912_p12), %v3172_v22, %v5569_v10  ;;  %v3205_v45 = vadd.f32 (!%p3912_p12), %v3173_v44, %v5571_v40  ;;  %v3175_v36 = vld [vmem:[#allocation2 + $0x90] sm:$0xff] (!%p3912_p12) }
 0x311   : > { %3231 = vst [vmem:[#allocation2 + $0x50] sm:$0xff] %v3199_v61  ;;  %3232 = vst [vmem:[#allocation2 + $0x58] sm:$0xff] %v3200_v31  ;;  %v3206_v15 = vadd.f32 %v3174_v41, %v5573_v38  ;;  %v3176_v9 = vld [vmem:[#allocation2 + $0x98] sm:$0xff]  ;;  %v3177_v58 = vld [vmem:[#allocation2 + $0xa0] sm:$0xff]  ;;  %v3207_v8 = vadd.f32 %v3175_v36, %v5575_v56 }
 0x312   : > { %3233 = vst [vmem:[#allocation2 + $0x60] sm:$0xff] %v3201_v12  ;;  %3234 = vst [vmem:[#allocation2 + $0x68] sm:$0xff] %v3202_v48  ;;  %v3208_v27 = vadd.f32 %v3176_v9, %v5577_v4  ;;  %v3209_v33 = vadd.f32 %v3177_v58, %v5579_v30  ;;  %v3178_v34 = vld [vmem:[#allocation2 + $0xa8] sm:$0xff]  ;;  %v3179_v29 = vld [vmem:[#allocation2 + $0xb0] sm:$0xff] }
 0x313   : > { %3235 = vst [vmem:[#allocation2 + $0x70] sm:$0xff] %v3203_v60  ;;  %v3180_v2 = vld [vmem:[#allocation2 + $0xb8] sm:$0xff]  ;;  %3236 = vst [vmem:[#allocation2 + $0x78] sm:$0xff] %v3204_v59  ;;  %v3210_v43 = vadd.f32 %v3178_v34, %v5581_v50  ;;  %v3211_v26 = vadd.f32 %v3179_v29, %v5583_v46  ;;  %v3181_v40 = vld [vmem:[#allocation2 + $0xc0] sm:$0xff] }
 0x314   : > { %3237 = vst [vmem:[#allocation2 + $0x80] sm:$0xff] %v3205_v45  ;;  %3238 = vst [vmem:[#allocation2 + $0x88] sm:$0xff] %v3206_v15  ;;  %v3212_v10 = vadd.f32 %v3180_v2, %v5585_v32  ;;  %v3182_v38 = vld [vmem:[#allocation2 + $0xc8] sm:$0xff]  ;;  %v3183_v21 = vld [vmem:[#allocation2 + $0xd0] sm:$0xff]  ;;  %v3213_v56 = vadd.f32 %v3181_v40, %v5587_v55 }
 0x315   : > { %3239 = vst [vmem:[#allocation2 + $0x90] sm:$0xff] %v3207_v8  ;;  %3240 = vst [vmem:[#allocation2 + $0x98] sm:$0xff] %v3208_v27  ;;  %v3214_v4 = vadd.f32 %v3182_v38, %v5589_v0  ;;  %v3215_v30 = vadd.f32 %v3183_v21, %v5591_v19  ;;  %v3184_v63 = vld [vmem:[#allocation2 + $0xd8] sm:$0xff]  ;;  %v3185_v53 = vld [vmem:[#allocation2 + $0xe0] sm:$0xff] }
 0x316   : > { %3241 = vst [vmem:[#allocation2 + $0xa0] sm:$0xff] %v3209_v33  ;;  %v3186_v52 = vld [vmem:[#allocation2 + $0xe8] sm:$0xff]  ;;  %3242 = vst [vmem:[#allocation2 + $0xa8] sm:$0xff] %v3210_v43  ;;  %v3216_v50 = vadd.f32 %v3184_v63, %v5593_v14  ;;  %v3217_v46 = vadd.f32 %v3185_v53, %v5595_v5  ;;  %v3187_v18 = vld [vmem:[#allocation2 + $0xf0] sm:$0xff] }
 0x317   : > { %3243 = vst [vmem:[#allocation2 + $0xb0] sm:$0xff] %v3211_v26  ;;  %3244 = vst [vmem:[#allocation2 + $0xb8] sm:$0xff] %v3212_v10  ;;  %v3218_v32 = vadd.f32 %v3186_v52, %v5597_v49  ;;  %v3188_v37 = vld [vmem:[#allocation2 + $0xf8] sm:$0xff]  ;;  %v3219_v55 = vadd.f32 %v3187_v18, %v5599_v17 }
 0x318   : > { %3245 = vst [vmem:[#allocation2 + $0xc0] sm:$0xff] %v3213_v56  ;;  %3246 = vst [vmem:[#allocation2 + $0xc8] sm:$0xff] %v3214_v4  ;;  %v3220_v0 = vadd.f32 %v3188_v37, %v5601_v1 }
 0x319   : > { %3247 = vst [vmem:[#allocation2 + $0xd0] sm:$0xff] %v3215_v30  ;;  %3248 = vst [vmem:[#allocation2 + $0xd8] sm:$0xff] %v3216_v50 }
 0x31a   : > { %3249 = vst [vmem:[#allocation2 + $0xe0] sm:$0xff] %v3217_v46  ;;  %3250 = vst [vmem:[#allocation2 + $0xe8] sm:$0xff] %v3218_v32 }
 0x31b   : > { %3251 = vst [vmem:[#allocation2 + $0xf0] sm:$0xff] %v3219_v55  ;;  %3252 = vst [vmem:[#allocation2 + $0xf8] sm:$0xff] %v3220_v0 }
 0x31c PF: > { %p3913_p4 = scmp.ne.s32.totalorder %s4540_s15, 1 }
 0x31d   : > { %v3269_v54 = vld [vmem:[#allocation2 + $0x60] sm:$0xff] (!%p3913_p4)  ;;  %v3270_v28 = vld [vmem:[#allocation2 + $0x68] sm:$0xff] (!%p3913_p4)  ;;  %v3271_v47 = vld [vmem:[#allocation2 + $0x70] sm:$0xff] (!%p3913_p4) }
 0x31e   : > { %3256 = sbr.rel (%p3913_p4) target bundleno = 814 (0x32e), region = 52  ;;  %v3257_v19 = vld [vmem:[#allocation2] sm:$0xff] (!%p3913_p4)  ;;  %v3258_v14 = vld [vmem:[#allocation2 + $0x8] sm:$0xff] (!%p3913_p4)  ;;  %3301 = vst [vmem:[#allocation8 + $0x60] sm:$0xff] (!%p3913_p4), %v3269_v54  ;;  %3302 = vst [vmem:[#allocation8 + $0x68] sm:$0xff] (!%p3913_p4), %v3270_v28 }
 0x31f   : > { %v3259_v5 = vld [vmem:[#allocation2 + $0x10] sm:$0xff] (!%p3913_p4)  ;;  %3289 = vst [vmem:[#allocation8] sm:$0xff] (!%p3913_p4), %v3257_v19  ;;  %3290 = vst [vmem:[#allocation8 + $0x8] sm:$0xff] (!%p3913_p4), %v3258_v14  ;;  %v3260_v49 = vld [vmem:[#allocation2 + $0x18] sm:$0xff] (!%p3913_p4) }
 0x320   : > { %3291 = vst [vmem:[#allocation8 + $0x10] sm:$0xff] (!%p3913_p4), %v3259_v5  ;;  %v3261_v20 = vld [vmem:[#allocation2 + $0x20] sm:$0xff] (!%p3913_p4)  ;;  %v3262_v17 = vld [vmem:[#allocation2 + $0x28] sm:$0xff] (!%p3913_p4)  ;;  %3292 = vst [vmem:[#allocation8 + $0x18] sm:$0xff] (!%p3913_p4), %v3260_v49 }
 0x321   : > { %3293 = vst [vmem:[#allocation8 + $0x20] sm:$0xff] (!%p3913_p4), %v3261_v20  ;;  %3294 = vst [vmem:[#allocation8 + $0x28] sm:$0xff] (!%p3913_p4), %v3262_v17  ;;  %v3263_v1 = vld [vmem:[#allocation2 + $0x30] sm:$0xff] (!%p3913_p4)  ;;  %v3264_v13 = vld [vmem:[#allocation2 + $0x38] sm:$0xff] (!%p3913_p4) }
 0x322   : > { %v3265_v3 = vld [vmem:[#allocation2 + $0x40] sm:$0xff] (!%p3913_p4)  ;;  %3295 = vst [vmem:[#allocation8 + $0x30] sm:$0xff] (!%p3913_p4), %v3263_v1  ;;  %3296 = vst [vmem:[#allocation8 + $0x38] sm:$0xff] (!%p3913_p4), %v3264_v13  ;;  %v3266_v24 = vld [vmem:[#allocation2 + $0x48] sm:$0xff] (!%p3913_p4) }
 0x323   : > { %3297 = vst [vmem:[#allocation8 + $0x40] sm:$0xff] (!%p3913_p4), %v3265_v3  ;;  %v3267_v23 = vld [vmem:[#allocation2 + $0x50] sm:$0xff] (!%p3913_p4)  ;;  %v3268_v25 = vld [vmem:[#allocation2 + $0x58] sm:$0xff] (!%p3913_p4)  ;;  %3298 = vst [vmem:[#allocation8 + $0x48] sm:$0xff] (!%p3913_p4), %v3266_v24 }
 0x324   : > { %3299 = vst [vmem:[#allocation8 + $0x50] sm:$0xff] (!%p3913_p4), %v3267_v23  ;;  %3300 = vst [vmem:[#allocation8 + $0x58] sm:$0xff] (!%p3913_p4), %v3268_v25  ;;  %v3272_v11 = vld [vmem:[#allocation2 + $0x78] sm:$0xff] (!%p3913_p4)  ;;  %v3273_v57 = vld [vmem:[#allocation2 + $0x80] sm:$0xff] (!%p3913_p4) }
 0x325   : > { %3303 = vst [vmem:[#allocation8 + $0x70] sm:$0xff] %v3271_v47  ;;  %v3274_v6 = vld [vmem:[#allocation2 + $0x88] sm:$0xff]  ;;  %3304 = vst [vmem:[#allocation8 + $0x78] sm:$0xff] %v3272_v11  ;;  %v3275_v39 = vld [vmem:[#allocation2 + $0x90] sm:$0xff] }
 0x326   : > { %3305 = vst [vmem:[#allocation8 + $0x80] sm:$0xff] %v3273_v57  ;;  %3306 = vst [vmem:[#allocation8 + $0x88] sm:$0xff] %v3274_v6  ;;  %v3276_v62 = vld [vmem:[#allocation2 + $0x98] sm:$0xff]  ;;  %v3277_v51 = vld [vmem:[#allocation2 + $0xa0] sm:$0xff] }
 0x327   : > { %3307 = vst [vmem:[#allocation8 + $0x90] sm:$0xff] %v3275_v39  ;;  %3308 = vst [vmem:[#allocation8 + $0x98] sm:$0xff] %v3276_v62  ;;  %v3278_v42 = vld [vmem:[#allocation2 + $0xa8] sm:$0xff]  ;;  %v3279_v61 = vld [vmem:[#allocation2 + $0xb0] sm:$0xff] }
 0x328   : > { %3309 = vst [vmem:[#allocation8 + $0xa0] sm:$0xff] %v3277_v51  ;;  %v3280_v31 = vld [vmem:[#allocation2 + $0xb8] sm:$0xff]  ;;  %3310 = vst [vmem:[#allocation8 + $0xa8] sm:$0xff] %v3278_v42  ;;  %v3281_v16 = vld [vmem:[#allocation2 + $0xc0] sm:$0xff] }
 0x329   : > { %3311 = vst [vmem:[#allocation8 + $0xb0] sm:$0xff] %v3279_v61  ;;  %3312 = vst [vmem:[#allocation8 + $0xb8] sm:$0xff] %v3280_v31  ;;  %v3282_v35 = vld [vmem:[#allocation2 + $0xc8] sm:$0xff]  ;;  %v3283_v7 = vld [vmem:[#allocation2 + $0xd0] sm:$0xff] }
 0x32a   : > { %3313 = vst [vmem:[#allocation8 + $0xc0] sm:$0xff] %v3281_v16  ;;  %3314 = vst [vmem:[#allocation8 + $0xc8] sm:$0xff] %v3282_v35  ;;  %v3284_v12 = vld [vmem:[#allocation2 + $0xd8] sm:$0xff]  ;;  %v3285_v48 = vld [vmem:[#allocation2 + $0xe0] sm:$0xff] }
 0x32b   : > { %3315 = vst [vmem:[#allocation8 + $0xd0] sm:$0xff] %v3283_v7  ;;  %v3286_v60 = vld [vmem:[#allocation2 + $0xe8] sm:$0xff]  ;;  %3316 = vst [vmem:[#allocation8 + $0xd8] sm:$0xff] %v3284_v12  ;;  %v3287_v22 = vld [vmem:[#allocation2 + $0xf0] sm:$0xff] }
 0x32c   : > { %3317 = vst [vmem:[#allocation8 + $0xe0] sm:$0xff] %v3285_v48  ;;  %3318 = vst [vmem:[#allocation8 + $0xe8] sm:$0xff] %v3286_v60  ;;  %v3288_v44 = vld [vmem:[#allocation2 + $0xf8] sm:$0xff] }
 0x32d   : > { %3319 = vst [vmem:[#allocation8 + $0xf0] sm:$0xff] %v3287_v22  ;;  %3320 = vst [vmem:[#allocation8 + $0xf8] sm:$0xff] %v3288_v44 }
 0x32e PF: > { %p5672_p8 = scmp.eq.s32.totalorder %s3433_s18, 1  ;;  %s4557_s27 = smov [#allocation8]  }
 0x32f   : > { %s3331_s25 = sshll.u32 %s4557_s27, 4  ;;  %s3332_s25 = int_to_ptr.vmem [resolvable:$true] %s3331_s25 }
 0x330   : > { %s4464_s23 = scalar_lea.vmem %s3332_s25, 4096  ;;  %p4471_p10 = scmp.lt.s32.totalorder %s3332_s25, %s3332_s25 }
 0x331   : > { %p4465_p2 = scmp.ne.s32.totalorder %s3332_s25, %s4464_s23  ;;  %p4472_p5 = scmp.lt.s32.totalorder %s4464_s23, %s4464_s23 }
 0x333   : > { %p4466_p3 = pnand %p4465_p2, %p5672_p8  ;;  %p4473_p6 = por %p4472_p5, %p4471_p10 }
 0x335   : > { %p4467_p0 = pneg %p4466_p3 }
 0x337   : > { %p4474_p11 = pnand %p4473_p6, %p4467_p0 }
 0x339   : > { %4477 = shalt.err (!%p4474_p11)
}
 0x33a   : > { %s4478_s18 = scalar_lea.hbm %s5719_s3, 4096 }
 0x33b   : > { %p4479_p13 = scmp.ne.s32.totalorder %s5719_s3, %s4478_s18  ;;  %p4484_p9 = scmp.lt.u32.totalorder %s4478_s18, %s5719_s3 }
 0x33d   : > { %p4480_p1 = pnand %p4479_p13, %p5672_p8 }
 0x33f   : > { %p4481_p7 = pneg %p4480_p1 }
 0x341   : > { %p4486_p12 = pnand %p4484_p9, %p4481_p7 }
 0x343   : > { %4489 = shalt.err (!%p4486_p12)
}
 0x344   : > { %s4558_s8 = smov 256   ;;  %s4559_s9 = smov 16  }
 0x345   : > { %3958 = dma.vmem_to_hbm [thread:$0]  (%p5672_p8), %s3332_s25, 4096, %s5719_s3, [#allocation5], %s4558_s8, %s4558_s8, %s4559_s9  }
 0x346   : > { %4523 = dma.done.wait (%p5672_p8), [#allocation5], 4096  }
 0x347   : > { %4525 = vsyncadd (%p5672_p8), [#allocation5], 4294963200 }
 0x348 PF: > { %s20_s17 = sadd.s32 1, %s4548_s17   ;;  %s5728_s12 = smov %s4532_s13 }
 0x349   : > { %p17_p4 = scmp.ge.s32.totalorder %s20_s17, 4   ;;  %s5729_s13 = smov %s4536_s14 }
 0x34a   : > { %s5730_s14 = smov %s4631_s24  ;;  %s5731_s15 = smov %s4544_s16 }
 0x34b   : > { %s5732_s16 = smov %s5734_s19  ;;  %19 = sbr.rel (!%p17_p4) target bundleno = 7 (0x7), region = 98 }
 0x352   :  { %3347 = vsyncpa [#allocation4], 1 }
 0x353   :  { %3349 = vsyncpa [#allocation4 + $0x1], 1 }
 0x354   :  { %3350 = vsyncpa [#allocation7], 1 }
 0x355   :  { %3352 = vsyncpa [#allocation7 + $0x1], 1 }
 0x356   :  { %3353 = vsyncpa [#allocation5], 1 }
 0x357   :  { %3355 = vsyncpa [#allocation5 + $0x1], 1 }

</bundles_post_ra>
